<compile_context>
chip_gen: v5e
topology: v5e:2x2
jax: 0.10.0
libtpu: 0.0.40
codegen_flags: <defaults>
</compile_context>

<pallas_src>
import jax
import jax.numpy as jnp
from jax.experimental import pallas as pl
from jax.experimental.pallas import tpu as pltpu


def mlp_kernel(x_ref, w1_ref, b1_ref, w2_ref, b2_ref, w3_ref, b3_ref, o_ref):
    # Fused 3-layer MLP for one batch tile. MXU operands are bf16, accumulation
    # is f32; bias+ReLU run on the f32 accumulator and the carried intermediate
    # is cast to bf16 once (v6e/v7x have bf16 VALU; on v5e keeping h1/h2 in f32
    # elementwise would be marginally preferable but numerics are identical
    # since the next matmul consumes bf16 anyway).
    x = x_ref[...]
    h1 = jnp.dot(x, w1_ref[...], preferred_element_type=jnp.float32)
    h1 = jnp.maximum(h1 + b1_ref[...], 0.0).astype(jnp.bfloat16)
    h2 = jnp.dot(h1, w2_ref[...], preferred_element_type=jnp.float32)
    h2 = jnp.maximum(h2 + b2_ref[...], 0.0).astype(jnp.bfloat16)
    out = jnp.dot(h2, w3_ref[...], preferred_element_type=jnp.float32) + b3_ref[...]
    o_ref[...] = out.astype(o_ref.dtype)


def _round_up(x, m):
    return (x + m - 1) // m * m


def _pad_to(a, shape):
    pads = [(0, s - d) for d, s in zip(a.shape, shape)]
    return jnp.pad(a, pads)


def prepare_params(params):
    """One-time padding + bf16 cast of the weights (hoisted out of the call path)."""
    w1, b1, w2, b2, w3, b3 = params
    K, H = w1.shape
    H2 = w2.shape[1]
    OUT = w3.shape[1]
    Kp, Hp, H2p, OUTp = (_round_up(d, 128) for d in (K, H, H2, OUT))

    w1p = _pad_to(w1, (Kp, Hp)).astype(jnp.bfloat16)
    b1p = _pad_to(b1.reshape(1, -1), (1, Hp)).astype(jnp.float32)
    w2p = _pad_to(w2, (Hp, H2p)).astype(jnp.bfloat16)
    b2p = _pad_to(b2.reshape(1, -1), (1, H2p)).astype(jnp.float32)
    w3p = _pad_to(w3, (H2p, OUTp)).astype(jnp.bfloat16)
    b3p = _pad_to(b3.reshape(1, -1), (1, OUTp)).astype(jnp.float32)

    return {
        "tensors": (w1p, b1p, w2p, b2p, w3p, b3p),
        "dims": (K, OUT),
        "padded_dims": (Kp, Hp, H2p, OUTp),
    }


def _choose_tile(B, tile_m):
    """Batch tile: pad batch only to a 16-row (bf16 sublane) boundary, shrink the
    tile for small batches, and force >= 2 grid steps when there is enough work
    so v7x's two TensorCores both engage (no-op on v5e/v6e)."""
    Bp16 = _round_up(max(B, 1), 16)
    tile = min(tile_m, Bp16)
    if Bp16 >= 256 and Bp16 <= tile:
        tile = _round_up((Bp16 + 1) // 2, 16)
    Bp = _round_up(Bp16, tile)
    return tile, Bp


def mlp_forward(x, prepared, *, tile_m=512):
    """x: (B, ...) flattened to (B, input_size). Returns (B, output_size) f32."""
    w1p, b1p, w2p, b2p, w3p, b3p = prepared["tensors"]
    K, OUT = prepared["dims"]
    Kp, Hp, H2p, OUTp = prepared["padded_dims"]

    B = x.shape[0]
    tile, Bp = _choose_tile(B, tile_m)

    # Per-call x prep only: flatten, cast to bf16, then pad the bf16 array
    # (single materialized padded copy).
    x2d = x.reshape(B, -1).astype(jnp.bfloat16)
    xp = _pad_to(x2d, (Bp, Kp))

    grid = (Bp // tile,)

    cost = pl.CostEstimate(
        flops=2 * Bp * (Kp * Hp + Hp * H2p + H2p * OUTp),
        transcendentals=0,
        bytes_accessed=(xp.size * 2
                        + (w1p.size + w2p.size + w3p.size) * 2
                        + (b1p.size + b2p.size + b3p.size) * 4
                        + Bp * OUTp * 4),
    )

    # Weights / biases: constant index_map + single-buffered -> DMA'd once,
    # VMEM-resident across all grid steps, no wasted second buffer.
    resident = dict(pipeline_mode=pl.Buffered(1))

    out_padded = pl.pallas_call(
        mlp_kernel,
        out_shape=jax.ShapeDtypeStruct((Bp, OUTp), jnp.float32),
        grid=grid,
        in_specs=[
            # x: one batch tile per grid step (double-buffered by Pallas).
            pl.BlockSpec((tile, Kp), lambda i: (i, 0)),
            pl.BlockSpec((Kp, Hp), lambda i: (0, 0), **resident),
            pl.BlockSpec((1, Hp), lambda i: (0, 0), **resident),
            pl.BlockSpec((Hp, H2p), lambda i: (0, 0), **resident),
            pl.BlockSpec((1, H2p), lambda i: (0, 0), **resident),
            pl.BlockSpec((H2p, OUTp), lambda i: (0, 0), **resident),
            pl.BlockSpec((1, OUTp), lambda i: (0, 0), **resident),
        ],
        out_specs=pl.BlockSpec((tile, OUTp), lambda i: (i, 0)),
        compiler_params=pltpu.CompilerParams(
            dimension_semantics=("parallel",)),
        cost_estimate=cost,
    )(xp, w1p, b1p, w2p, b2p, w3p, b3p)

    return out_padded[:B, :OUT]


def init_params(key, input_size=784, hidden_size=400, output_size=10):
    """Deterministic init mimicking nn.Linear default (uniform +-1/sqrt(fan_in)).
    Weights stored as (in, out); biases as (out,)."""
    ks = jax.random.split(key, 6)

    def linear(kw, kb, fan_in, fan_out):
        bound = 1.0 / jnp.sqrt(jnp.float32(fan_in))
        w = jax.random.uniform(kw, (fan_in, fan_out), jnp.float32, -bound, bound)
        b = jax.random.uniform(kb, (fan_out,), jnp.float32, -bound, bound)
        return w, b

    w1, b1 = linear(ks[0], ks[1], input_size, hidden_size)
    w2, b2 = linear(ks[2], ks[3], hidden_size, hidden_size)
    w3, b3 = linear(ks[4], ks[5], hidden_size, output_size)
    return (w1, b1, w2, b2, w3, b3)


def mlp_reference(x, params):
    # Full-precision f32 reference (matches PyTorch semantics).
    w1, b1, w2, b2, w3, b3 = params
    x2d = x.reshape(x.shape[0], -1).astype(jnp.float32)
    h1 = jnp.maximum(x2d @ w1 + b1, 0.0)
    h2 = jnp.maximum(h1 @ w2 + b2, 0.0)
    return h2 @ w3 + b3


if __name__ == "__main__":
    key = jax.random.PRNGKey(0)
    k_x, k_p = jax.random.split(key)

    # Small MNIST-like batch: NCHW (4, 1, 28, 28) -> flattened to 784 features.
    x = jax.random.normal(k_x, (4, 1, 28, 28), dtype=jnp.float32)
    params = init_params(k_p, input_size=784, hidden_size=400, output_size=10)
    prepared = prepare_params(params)

    out = mlp_forward(x, prepared)
    out = jax.block_until_ready(out)

    ref = mlp_reference(x, params)
    assert out.shape == (4, 10), out.shape
    # bf16 matmul operands / intermediates with f32 accumulation -> relaxed
    # tolerance vs the f32 reference.
    assert jnp.allclose(out, ref, atol=2e-2, rtol=2e-2), "mismatch vs reference"

    print("KERNEL_OK")
</pallas_src>

<mosaic_0001>
module attributes {stable_mosaic.version = 11 : i64} {
  func.func @mlp_kernel(%arg0: i32, %arg1: memref<16x896xbf16, #tpu.memory_space<vmem>>, %arg2: memref<896x512xbf16, #tpu.memory_space<vmem>>, %arg3: memref<1x512xf32, #tpu.memory_space<vmem>>, %arg4: memref<512x512xbf16, #tpu.memory_space<vmem>>, %arg5: memref<1x512xf32, #tpu.memory_space<vmem>>, %arg6: memref<512x128xbf16, #tpu.memory_space<vmem>>, %arg7: memref<1x128xf32, #tpu.memory_space<vmem>>, %arg8: memref<16x128xf32, #tpu.memory_space<vmem>>) attributes {dimension_semantics = [#tpu.dimension_semantics<parallel>], iteration_bounds = array<i64: 1>, scalar_prefetch = 0 : i64, scratch_operands = 0 : i64, tpu.core_type = #tpu.core_type<tc>, window_params = [{transform_indices = @transform_0, window_bounds = array<i64: 16, 896>}, {pipeline_mode = #tpu.pipeline_mode<synchronous>, transform_indices = @transform_1, window_bounds = array<i64: 896, 512>}, {pipeline_mode = #tpu.pipeline_mode<synchronous>, transform_indices = @transform_2, window_bounds = array<i64: 1, 512>}, {pipeline_mode = #tpu.pipeline_mode<synchronous>, transform_indices = @transform_3, window_bounds = array<i64: 512, 512>}, {pipeline_mode = #tpu.pipeline_mode<synchronous>, transform_indices = @transform_4, window_bounds = array<i64: 1, 512>}, {pipeline_mode = #tpu.pipeline_mode<synchronous>, transform_indices = @transform_5, window_bounds = array<i64: 512, 128>}, {pipeline_mode = #tpu.pipeline_mode<synchronous>, transform_indices = @transform_6, window_bounds = array<i64: 1, 128>}, {transform_indices = @transform_7, window_bounds = array<i64: 16, 128>}]} {
    %c0 = arith.constant 0 : index
    %c0_0 = arith.constant 0 : index
    %0 = vector.load %arg1[%c0, %c0_0] : memref<16x896xbf16, #tpu.memory_space<vmem>>, vector<16x896xbf16>
    %c0_1 = arith.constant 0 : index
    %c0_2 = arith.constant 0 : index
    %1 = vector.load %arg2[%c0_1, %c0_2] : memref<896x512xbf16, #tpu.memory_space<vmem>>, vector<896x512xbf16>
    %cst = arith.constant dense<0.000000e+00> : vector<16x512xf32>
    %2 = tpu.matmul %0, %1, %cst {dimension_numbers = #tpu.dot_dimension_numbers<[1], [0], [0], [1], [0, 0, 1, 1], [], []>} : vector<16x896xbf16>, vector<896x512xbf16>, vector<16x512xf32> -> vector<16x512xf32>
    %c0_3 = arith.constant 0 : index
    %c0_4 = arith.constant 0 : index
    %3 = vector.load %arg3[%c0_3, %c0_4] : memref<1x512xf32, #tpu.memory_space<vmem>>, vector<1x512xf32>
    %4 = vector.broadcast %3 : vector<1x512xf32> to vector<16x512xf32>
    %5 = arith.addf %2, %4 : vector<16x512xf32>
    %cst_5 = arith.constant 0.000000e+00 : f32
    %6 = vector.broadcast %cst_5 : f32 to vector<16x512xf32>
    %7 = arith.maximumf %5, %6 : vector<16x512xf32>
    %8 = arith.truncf %7 : vector<16x512xf32> to vector<16x512xbf16>
    %c0_6 = arith.constant 0 : index
    %c0_7 = arith.constant 0 : index
    %9 = vector.load %arg4[%c0_6, %c0_7] : memref<512x512xbf16, #tpu.memory_space<vmem>>, vector<512x512xbf16>
    %cst_8 = arith.constant dense<0.000000e+00> : vector<16x512xf32>
    %10 = tpu.matmul %8, %9, %cst_8 {dimension_numbers = #tpu.dot_dimension_numbers<[1], [0], [0], [1], [0, 0, 1, 1], [], []>} : vector<16x512xbf16>, vector<512x512xbf16>, vector<16x512xf32> -> vector<16x512xf32>
    %c0_9 = arith.constant 0 : index
    %c0_10 = arith.constant 0 : index
    %11 = vector.load %arg5[%c0_9, %c0_10] : memref<1x512xf32, #tpu.memory_space<vmem>>, vector<1x512xf32>
    %12 = vector.broadcast %11 : vector<1x512xf32> to vector<16x512xf32>
    %13 = arith.addf %10, %12 : vector<16x512xf32>
    %cst_11 = arith.constant 0.000000e+00 : f32
    %14 = vector.broadcast %cst_11 : f32 to vector<16x512xf32>
    %15 = arith.maximumf %13, %14 : vector<16x512xf32>
    %16 = arith.truncf %15 : vector<16x512xf32> to vector<16x512xbf16>
    %c0_12 = arith.constant 0 : index
    %c0_13 = arith.constant 0 : index
    %17 = vector.load %arg6[%c0_12, %c0_13] : memref<512x128xbf16, #tpu.memory_space<vmem>>, vector<512x128xbf16>
    %cst_14 = arith.constant dense<0.000000e+00> : vector<16x128xf32>
    %18 = tpu.matmul %16, %17, %cst_14 {dimension_numbers = #tpu.dot_dimension_numbers<[1], [0], [0], [1], [0, 0, 1, 1], [], []>} : vector<16x512xbf16>, vector<512x128xbf16>, vector<16x128xf32> -> vector<16x128xf32>
    %c0_15 = arith.constant 0 : index
    %c0_16 = arith.constant 0 : index
    %19 = vector.load %arg7[%c0_15, %c0_16] : memref<1x128xf32, #tpu.memory_space<vmem>>, vector<1x128xf32>
    %20 = vector.broadcast %19 : vector<1x128xf32> to vector<16x128xf32>
    %21 = arith.addf %18, %20 : vector<16x128xf32>
    %c0_17 = arith.constant 0 : index
    %c0_18 = arith.constant 0 : index
    %22 = vector.load %arg8[%c0_17, %c0_18] : memref<16x128xf32, #tpu.memory_space<vmem>>, vector<16x128xf32>
    tpu.vector_store %arg8[%c0_17, %c0_18], %21 {strides = array<i32>} : memref<16x128xf32, #tpu.memory_space<vmem>>, vector<16x128xf32>,
    return
  }
  func.func @transform_0(%arg0: i32) -> (i32, i32) {
    %c0_i32 = arith.constant 0 : i32
    %c0_i32_0 = arith.constant 0 : i32
    return %arg0, %c0_i32 : i32, i32
  }
  func.func @transform_1(%arg0: i32) -> (i32, i32) {
    %c0_i32 = arith.constant 0 : i32
    %c0_i32_0 = arith.constant 0 : i32
    %c0_i32_1 = arith.constant 0 : i32
    return %c0_i32, %c0_i32_0 : i32, i32
  }
  func.func @transform_2(%arg0: i32) -> (i32, i32) {
    %c0_i32 = arith.constant 0 : i32
    %c0_i32_0 = arith.constant 0 : i32
    %c0_i32_1 = arith.constant 0 : i32
    return %c0_i32, %c0_i32_0 : i32, i32
  }
  func.func @transform_3(%arg0: i32) -> (i32, i32) {
    %c0_i32 = arith.constant 0 : i32
    %c0_i32_0 = arith.constant 0 : i32
    %c0_i32_1 = arith.constant 0 : i32
    return %c0_i32, %c0_i32_0 : i32, i32
  }
  func.func @transform_4(%arg0: i32) -> (i32, i32) {
    %c0_i32 = arith.constant 0 : i32
    %c0_i32_0 = arith.constant 0 : i32
    %c0_i32_1 = arith.constant 0 : i32
    return %c0_i32, %c0_i32_0 : i32, i32
  }
  func.func @transform_5(%arg0: i32) -> (i32, i32) {
    %c0_i32 = arith.constant 0 : i32
    %c0_i32_0 = arith.constant 0 : i32
    %c0_i32_1 = arith.constant 0 : i32
    return %c0_i32, %c0_i32_0 : i32, i32
  }
  func.func @transform_6(%arg0: i32) -> (i32, i32) {
    %c0_i32 = arith.constant 0 : i32
    %c0_i32_0 = arith.constant 0 : i32
    %c0_i32_1 = arith.constant 0 : i32
    return %c0_i32, %c0_i32_0 : i32, i32
  }
  func.func @transform_7(%arg0: i32) -> (i32, i32) {
    %c0_i32 = arith.constant 0 : i32
    %c0_i32_0 = arith.constant 0 : i32
    return %arg0, %c0_i32 : i32, i32
  }
}

</mosaic_0001>

<bundles_post_ra>
// kernel: tpu_custom_call.1
= control target key start
LH: loop header
LB: loop body
LE: loop exit
PB: predicated region body
PF: predicated region fallthrough
CT: control target
= control target key end

     0   :  { %12 = vsyncpa [#allocation3], 0  ;;  %s5597_s0 = inlined_call_operand.hbm [shape: bf16[16,896], index: 0, kind: input, shape index: {}]   ;;  %s5598_s1 = inlined_call_operand.hbm [shape: bf16[896,512], index: 1, kind: input, shape index: {}]   ;;  %s5599_s2 = inlined_call_operand.hbm [shape: f32[1,512], index: 2, kind: input, shape index: {}]   ;;  %s5600_s3 = inlined_call_operand.hbm [shape: bf16[512,512], index: 3, kind: input, shape index: {}]   ;;  %s5601_s4 = inlined_call_operand.hbm [shape: f32[1,512], index: 4, kind: input, shape index: {}]   ;;  %s5602_s5 = inlined_call_operand.hbm [shape: bf16[512,128], index: 5, kind: input, shape index: {}]   ;;  %s5603_s6 = inlined_call_operand.vmem [shape: f32[1,128], index: 6, kind: input, shape index: {}]   ;;  %s5604_s7 = inlined_call_operand.hbm [shape: f32[16,128], index: 7, kind: output, shape index: {}]  }
   0x1   :  { %13 = vsyncpa [#allocation6], 0 }
   0x2   :  { %14 = vsyncpa [#allocation9], 0 }
   0x3   :  { %15 = vsyncpa [#allocation12], 0  ;;  %s34_s26 = sshll.u32 %s5598_s1, 4  ;;  %s35_s26 = int_to_ptr.hbm [resolvable:$true] %s34_s26 }
   0x4   :  { %16 = vsyncpa [#allocation4], 0  ;;  %s5423_s27 = smov [#allocation5]   ;;  %s58_s8 = sshll.u32 %s5600_s3, 4  ;;  %s59_s8 = int_to_ptr.hbm [resolvable:$true] %s58_s8 }
   0x5   :  { %s36_s28 = sshll.u32 %s5423_s27, 4  ;;  %s5424_s9 = smov 256   ;;  %s37_s28 = int_to_ptr.vmem [resolvable:$true] %s36_s28 }
   0x6   :  { %s5425_s10 = smov 16   ;;  %s5426_s11 = smov [#allocation8]  }
   0x7   :  { %42 = dma.hbm_to_vmem [thread:$0]  %s35_s26, 28672, %s37_s28, [#allocation6], %s5424_s9, %s5424_s9, %s5425_s10  }
   0x8   :  { %s60_s12 = sshll.u32 %s5426_s11, 4  ;;  %s21_s15 = sshll.u32 %s5597_s0, 4  ;;  %s61_s12 = int_to_ptr.vmem [resolvable:$true] %s60_s12  ;;  %s22_s15 = int_to_ptr.hbm [resolvable:$true] %s21_s15 }
   0x9   :  { %66 = dma.hbm_to_vmem [thread:$0]  %s59_s8, 16384, %s61_s12, [#allocation9], %s5424_s9, %s5424_s9, %s5425_s10  }
   0xa   :  { %s5427_s1 = smov [#allocation2]   ;;  %s48_s3 = sshll.u32 %s5599_s2, 4  ;;  %s49_s3 = int_to_ptr.hbm [resolvable:$true] %s48_s3 }
   0xb   :  { %s23_s16 = sshll.u32 %s5427_s1, 4  ;;  %s5428_s19 = smov 448   ;;  %s24_s16 = int_to_ptr.vmem [resolvable:$true] %s23_s16 }
   0xc   :  { %s5429_s20 = smov 28   ;;  %s5430_s21 = smov [#allocation7]  }
   0xd   :  { %29 = dma.hbm_to_vmem [thread:$0]  %s22_s15, 896, %s24_s16, [#allocation3], %s5428_s19, %s5428_s19, %s5429_s20  }
   0xe   :  { %s50_s22 = sshll.u32 %s5430_s21, 4  ;;  %s72_s0 = sshll.u32 %s5601_s4, 4  ;;  %s51_s22 = int_to_ptr.vmem [resolvable:$true] %s50_s22  ;;  %s73_s0 = int_to_ptr.hbm [resolvable:$true] %s72_s0 }
   0xf   :  { %53 = dma.hbm_to_vmem [thread:$0]  %s49_s3, 64, %s51_s22, [#allocation6]  }
  0x10   :  { %s82_s27 = sshll.u32 %s5602_s5, 4  ;;  %s5431_s28 = smov [#allocation10]   ;;  %s83_s27 = int_to_ptr.hbm [resolvable:$true] %s82_s27 }
  0x11   :  { %s74_s29 = sshll.u32 %s5431_s28, 4  ;;  %s5432_s2 = smov [#allocation11]   ;;  %s75_s29 = int_to_ptr.vmem [resolvable:$true] %s74_s29 }
  0x12   :  { %77 = dma.hbm_to_vmem [thread:$0]  %s73_s0, 64, %s75_s29, [#allocation9]  }
  0x13   :  { %s84_s30 = sshll.u32 %s5432_s2, 4  ;;  %s5433_s8 = smov 64   ;;  %s85_s30 = int_to_ptr.vmem [resolvable:$true] %s84_s30 }
  0x14   :  { %s5434_s9 = smov 4  }
  0x15   :  { %90 = dma.hbm_to_vmem [thread:$0]  %s83_s27, 4096, %s85_s30, [#allocation12], %s5433_s8, %s5433_s8, %s5434_s9  }
  0x16   :  { %5413 = dma.done.wait [#allocation3], 896  }
  0x17   :  { %5414 = vsyncadd [#allocation3], 4294966400 }
  0x18   :  { %5415 = dma.done.wait [#allocation6], 28736  }
  0x19   :  { %5416 = vsyncadd [#allocation6], 4294938560 }
  0x1a   :  { %5417 = dma.done.wait [#allocation9], 16448  }
  0x1b   :  { %5418 = vsyncadd [#allocation9], 4294950848 }
  0x1c   :  { %5419 = dma.done.wait [#allocation12], 4096  }
  0x1d   :  { %5420 = vsyncadd [#allocation12], 4294963200  ;;  %v3415_v0 = vld [vmem:[#allocation5 + $0xe0] sm:$0xf]  ;;  %v4874_v1 = vld [vmem:[#allocation5 + $0xec] sm:$0xf0] }
  0x1e   :  { %v3543_v2 = vld [vmem:[#allocation5 + $0x1e0] sm:$0xf]  ;;  %v3416_v3 = vor.u32 %v4874_v1, %v3415_v0  ;;  %v4906_v4 = vld [vmem:[#allocation5 + $0x1ec] sm:$0xf0]  ;;  %s5435_s10 = smov [#allocation13]   ;;  %s3257_s14 = sshll.u32 %s5604_s7, 4  ;;  %s3258_s14 = int_to_ptr.hbm [resolvable:$true] %s3257_s14 }
  0x1f   :  { %v3671_v5 = vld [vmem:[#allocation5 + $0x2e0] sm:$0xf]  ;;  %v4938_v6 = vld [vmem:[#allocation5 + $0x2ec] sm:$0xf0]  ;;  %v3544_v7 = vor.u32 %v4906_v4, %v3543_v2  ;;  %s3255_s11 = sshll.u32 %s5435_s10, 4  ;;  %s5437_s15 = smov 8   ;;  %s3256_s11 = int_to_ptr.vmem [resolvable:$true] %s3255_s11 }
  0x20   :  { %v3672_v8 = vor.u32 %v4938_v6, %v3671_v5  ;;  %v3799_v9 = vld [vmem:[#allocation5 + $0x3e0] sm:$0xf]  ;;  %v4970_v10 = vld [vmem:[#allocation5 + $0x3ec] sm:$0xf0]  ;;  %1515 = vmatpush.bf16.msra.mxu0 %v3416_v3 }
  0x21   :  { %v3399_v11 = vld [vmem:[#allocation5 + $0xc0] sm:$0xf]  ;;  %v3800_v12 = vor.u32 %v4970_v10, %v3799_v9  ;;  %v4870_v13 = vld [vmem:[#allocation5 + $0xcc] sm:$0xf0]  ;;  %1529 = vmatpush.bf16.msra.mxu1 %v3544_v7 }
  0x22   :  { %v3527_v14 = vld [vmem:[#allocation5 + $0x1c0] sm:$0xf]  ;;  %v4902_v15 = vld [vmem:[#allocation5 + $0x1cc] sm:$0xf0]  ;;  %1543 = vmatpush.bf16.msra.mxu2 %v3672_v8  ;;  %v3400_v16 = vor.u32 %v4870_v13, %v3399_v11 }
  0x23   :  { %v3528_v17 = vor.u32 %v4902_v15, %v3527_v14  ;;  %v3655_v18 = vld [vmem:[#allocation5 + $0x2c0] sm:$0xf]  ;;  %v4934_v19 = vld [vmem:[#allocation5 + $0x2cc] sm:$0xf0]  ;;  %1557 = vmatpush.bf16.msra.mxu3 %v3800_v12 }
  0x24   :  { %v3783_v20 = vld [vmem:[#allocation5 + $0x3c0] sm:$0xf]  ;;  %v3656_v21 = vor.u32 %v4934_v19, %v3655_v18  ;;  %v4966_v22 = vld [vmem:[#allocation5 + $0x3cc] sm:$0xf0]  ;;  %1516 = vmatpush.bf16.msra.mxu0 %v3400_v16 }
  0x25   :  { %v3383_v23 = vld [vmem:[#allocation5 + $0xa0] sm:$0xf]  ;;  %v4866_v24 = vld [vmem:[#allocation5 + $0xac] sm:$0xf0]  ;;  %v3784_v25 = vor.u32 %v4966_v22, %v3783_v20  ;;  %1530 = vmatpush.bf16.msra.mxu1 %v3528_v17 }
  0x26   :  { %v3511_v26 = vld [vmem:[#allocation5 + $0x1a0] sm:$0xf]  ;;  %v4898_v27 = vld [vmem:[#allocation5 + $0x1ac] sm:$0xf0]  ;;  %v3384_v29 = vor.u32 %v4866_v24, %v3383_v23  ;;  %1544 = vmatpush.bf16.msra.mxu2 %v3656_v21 }
  0x27   :  { %v3639_v28 = vld [vmem:[#allocation5 + $0x2a0] sm:$0xf]  ;;  %v4930_v30 = vld [vmem:[#allocation5 + $0x2ac] sm:$0xf0]  ;;  %v3512_v33 = vor.u32 %v4898_v27, %v3511_v26  ;;  %1558 = vmatpush.bf16.msra.mxu3 %v3784_v25 }
  0x28   :  { %v3767_v31 = vld [vmem:[#allocation5 + $0x3a0] sm:$0xf]  ;;  %v4962_v32 = vld [vmem:[#allocation5 + $0x3ac] sm:$0xf0]  ;;  %v3640_v34 = vor.u32 %v4930_v30, %v3639_v28  ;;  %1517 = vmatpush.bf16.msra.mxu0 %v3384_v29 }
  0x29   :  { %v3367_v35 = vld [vmem:[#allocation5 + $0x80] sm:$0xf]  ;;  %v4862_v36 = vld [vmem:[#allocation5 + $0x8c] sm:$0xf0]  ;;  %v3768_v38 = vor.u32 %v4962_v32, %v3767_v31  ;;  %1531 = vmatpush.bf16.msra.mxu1 %v3512_v33 }
  0x2a   :  { %v3495_v37 = vld [vmem:[#allocation5 + $0x180] sm:$0xf]  ;;  %v4894_v39 = vld [vmem:[#allocation5 + $0x18c] sm:$0xf0]  ;;  %v3368_v44 = vor.u32 %v4862_v36, %v3367_v35  ;;  %1545 = vmatpush.bf16.msra.mxu2 %v3640_v34 }
  0x2b   :  { %v3623_v40 = vld [vmem:[#allocation5 + $0x280] sm:$0xf]  ;;  %v4926_v41 = vld [vmem:[#allocation5 + $0x28c] sm:$0xf0]  ;;  %v3496_v45 = vor.u32 %v4894_v39, %v3495_v37  ;;  %1559 = vmatpush.bf16.msra.mxu3 %v3768_v38  ;;  %v4872_v37 = vld [vmem:[#allocation5 + $0xe4] sm:$0xf] }
  0x2c   :  { %v3751_v42 = vld [vmem:[#allocation5 + $0x380] sm:$0xf]  ;;  %v4958_v43 = vld [vmem:[#allocation5 + $0x38c] sm:$0xf0]  ;;  %v3624_v46 = vor.u32 %v4926_v41, %v3623_v40  ;;  %1518 = vmatpush.bf16.msra.mxu0 %v3368_v44  ;;  %v3417_v38 = vld [vmem:[#allocation5 + $0xf0] sm:$0xf0] }
  0x2d   :  { %v3351_v47 = vld [vmem:[#allocation5 + $0x60] sm:$0xf]  ;;  %v4858_v48 = vld [vmem:[#allocation5 + $0x6c] sm:$0xf0]  ;;  %v3752_v50 = vor.u32 %v4958_v43, %v3751_v42  ;;  %1532 = vmatpush.bf16.msra.mxu1 %v3496_v45 }
  0x2e   :  { %v3479_v49 = vld [vmem:[#allocation5 + $0x160] sm:$0xf]  ;;  %v4890_v51 = vld [vmem:[#allocation5 + $0x16c] sm:$0xf0]  ;;  %v3352_v56 = vor.u32 %v4858_v48, %v3351_v47  ;;  %1546 = vmatpush.bf16.msra.mxu2 %v3624_v46  ;;  %v3420_v48 = vor.u32 %v4872_v37, %v3417_v38 }
  0x2f   :  { %v3607_v52 = vld [vmem:[#allocation5 + $0x260] sm:$0xf]  ;;  %v4922_v53 = vld [vmem:[#allocation5 + $0x26c] sm:$0xf0]  ;;  %v3480_v57 = vor.u32 %v4890_v51, %v3479_v49  ;;  %1560 = vmatpush.bf16.msra.mxu3 %v3752_v50  ;;  %v4868_v50 = vld [vmem:[#allocation5 + $0xc4] sm:$0xf] }
  0x30   :  { %v3735_v54 = vld [vmem:[#allocation5 + $0x360] sm:$0xf]  ;;  %v4954_v55 = vld [vmem:[#allocation5 + $0x36c] sm:$0xf0]  ;;  %v3608_v58 = vor.u32 %v4922_v53, %v3607_v52  ;;  %1519 = vmatpush.bf16.msra.mxu0 %v3352_v56  ;;  %v3401_v51 = vld [vmem:[#allocation5 + $0xd0] sm:$0xf0] }
  0x31   :  { %v3335_v59 = vld [vmem:[#allocation5 + $0x40] sm:$0xf]  ;;  %v4854_v60 = vld [vmem:[#allocation5 + $0x4c] sm:$0xf0]  ;;  %v3736_v62 = vor.u32 %v4954_v55, %v3735_v54  ;;  %1533 = vmatpush.bf16.msra.mxu1 %v3480_v57  ;;  %v3275_v52 = vld [vmem:[#allocation2] sm:$0xf] }
  0x32   :  { %v3463_v61 = vld [vmem:[#allocation5 + $0x140] sm:$0xf]  ;;  %v4886_v63 = vld [vmem:[#allocation5 + $0x14c] sm:$0xf0]  ;;  %v3336_v4 = vor.u32 %v4854_v60, %v3335_v59  ;;  %1547 = vmatpush.bf16.msra.mxu2 %v3608_v58  ;;  %v4840_v53 = vld [vmem:[#allocation2 + $0x18] sm:$0xf0] }
  0x33   :  { %v3591_v0 = vld [vmem:[#allocation5 + $0x240] sm:$0xf]  ;;  %v4918_v1 = vld [vmem:[#allocation5 + $0x24c] sm:$0xf0]  ;;  %v3464_v5 = vor.u32 %v4886_v63, %v3463_v61  ;;  %1561 = vmatpush.bf16.msra.mxu3 %v3736_v62  ;;  %v5496_v57 = vor.u32 %v4840_v53, %v3275_v52  ;;  %v4841_v58 = vld [vmem:[#allocation2 + $0x20] sm:$0xf0] }
  0x34   :  { %v3719_v2 = vld [vmem:[#allocation5 + $0x340] sm:$0xf]  ;;  %v4950_v3 = vld [vmem:[#allocation5 + $0x34c] sm:$0xf0]  ;;  %v3592_v6 = vor.u32 %v4918_v1, %v3591_v0  ;;  %1520 = vmatpush.bf16.msra.mxu0 %v3336_v4  ;;  %v3404_v1 = vor.u32 %v4868_v50, %v3401_v51  ;;  %v4864_v4 = vld [vmem:[#allocation5 + $0xa4] sm:$0xf] }
  0x35   :  { %v3319_v7 = vld [vmem:[#allocation5 + $0x20] sm:$0xf]  ;;  %v4850_v8 = vld [vmem:[#allocation5 + $0x2c] sm:$0xf0]  ;;  %v3720_v10 = vor.u32 %v4950_v3, %v3719_v2  ;;  %1534 = vmatpush.bf16.msra.mxu1 %v3464_v5  ;;  %v3385_v5 = vld [vmem:[#allocation5 + $0xb0] sm:$0xf0] }
  0x36   :  { %v3447_v9 = vld [vmem:[#allocation5 + $0x120] sm:$0xf]  ;;  %v4882_v11 = vld [vmem:[#allocation5 + $0x12c] sm:$0xf0]  ;;  %v3320_v16 = vor.u32 %v4850_v8, %v3319_v7  ;;  %1548 = vmatpush.bf16.msra.mxu2 %v3592_v6  ;;  %v4837_v6 = vld [vmem:[#allocation2 + $0x4] sm:$0xf] }
  0x37   :  { %v3575_v12 = vld [vmem:[#allocation5 + $0x220] sm:$0xf]  ;;  %v4914_v13 = vld [vmem:[#allocation5 + $0x22c] sm:$0xf0]  ;;  %v3448_v19 = vor.u32 %v4882_v11, %v3447_v9  ;;  %1562 = vmatpush.bf16.msra.mxu3 %v3720_v10  ;;  %v3277_v7 = vld [vmem:[#allocation2 + $0x1c] sm:$0xf0] }
  0x38   :  { %v3703_v14 = vld [vmem:[#allocation5 + $0x320] sm:$0xf]  ;;  %v4946_v15 = vld [vmem:[#allocation5 + $0x32c] sm:$0xf0]  ;;  %v3576_v20 = vor.u32 %v4914_v13, %v3575_v12  ;;  %1521 = vmatpush.bf16.msra.mxu0 %v3320_v16  ;;  %v5502_v11 = vor.u32 %v4837_v6, %v3277_v7  ;;  %v4844_v7 = vld [vmem:[#allocation5 + $0x4] sm:$0xf] }
  0x39   :  { %v3303_v17 = vld [vmem:[#allocation5] sm:$0xf]  ;;  %v4846_v18 = vld [vmem:[#allocation5 + $0xc] sm:$0xf0]  ;;  %v3704_v24 = vor.u32 %v4946_v15, %v3703_v14  ;;  %1535 = vmatpush.bf16.msra.mxu1 %v3448_v19  ;;  %v4838_v19 = vld [vmem:[#allocation2 + $0xc] sm:$0xf] }
  0x3a   :  { %v3431_v21 = vld [vmem:[#allocation5 + $0x100] sm:$0xf]  ;;  %v4878_v22 = vld [vmem:[#allocation5 + $0x10c] sm:$0xf0]  ;;  %v3304_v31 = vor.u32 %v4846_v18, %v3303_v17  ;;  %1549 = vmatpush.bf16.msra.mxu2 %v3576_v20  ;;  %v3388_v17 = vor.u32 %v4864_v4, %v3385_v5 }
  0x3b   :  { %v3559_v23 = vld [vmem:[#allocation5 + $0x200] sm:$0xf]  ;;  %v4910_v25 = vld [vmem:[#allocation5 + $0x20c] sm:$0xf0]  ;;  %v3432_v35 = vor.u32 %v4878_v22, %v3431_v21  ;;  %1563 = vmatpush.bf16.msra.mxu3 %v3704_v24  ;;  %v4860_v21 = vld [vmem:[#allocation5 + $0x84] sm:$0xf] }
  0x3c   :  { %v3687_v26 = vld [vmem:[#allocation5 + $0x300] sm:$0xf]  ;;  %v4942_v27 = vld [vmem:[#allocation5 + $0x30c] sm:$0xf0]  ;;  %v3560_v36 = vor.u32 %v4910_v25, %v3559_v23  ;;  %1522 = vmatpush.bf16.msra.mxu0 %v3304_v31  ;;  %v3369_v22 = vld [vmem:[#allocation5 + $0x90] sm:$0xf0] }
  0x3d   :  { %v3927_v28 = vld [vmem:[#allocation5 + $0x4e0] sm:$0xf]  ;;  %v5002_v29 = vld [vmem:[#allocation5 + $0x4ec] sm:$0xf0]  ;;  %v3688_v39 = vor.u32 %v4942_v27, %v3687_v26  ;;  %1536 = vmatpush.bf16.msra.mxu1 %v3432_v35  ;;  %v3353_v35 = vld [vmem:[#allocation5 + $0x70] sm:$0xf0] }
  0x3e   :  { %v4055_v30 = vld [vmem:[#allocation5 + $0x5e0] sm:$0xf]  ;;  %v5034_v32 = vld [vmem:[#allocation5 + $0x5ec] sm:$0xf0]  ;;  %v3928_v40 = vor.u32 %v5002_v29, %v3927_v28  ;;  %1550 = vmatpush.bf16.msra.mxu2 %v3560_v36 }
  0x3f   :  { %v4183_v33 = vld [vmem:[#allocation5 + $0x6e0] sm:$0xf]  ;;  %v5066_v34 = vld [vmem:[#allocation5 + $0x6ec] sm:$0xf0]  ;;  %v4056_v43 = vor.u32 %v5034_v32, %v4055_v30  ;;  %1564 = vmatpush.bf16.msra.mxu3 %v3688_v39  ;;  %1523 = vmatmul.bf16.vlgmr.msra.gmra.mxu0 %v5496_v57  ;;  %v3372_v30 = vor.u32 %v4860_v21, %v3369_v22  ;;  %v3291_v22 = vld [vmem:[#allocation2 + $0x10] sm:$0xf] }
  0x40   :  { %v3911_v41 = vld [vmem:[#allocation5 + $0x4c0] sm:$0xf]  ;;  %v4998_v42 = vld [vmem:[#allocation5 + $0x4cc] sm:$0xf0]  ;;  %v4184_v44 = vor.u32 %v5066_v34, %v4183_v33  ;;  %1571 = vmatpush.bf16.msrb.mxu0 %v3928_v40  ;;  %1537 = vmatmul.bf16.vlgmr.msra.gmra.mxu1 %v5502_v11  ;;  %v4856_v34 = vld [vmem:[#allocation5 + $0x64] sm:$0xf] }
  0x41   :  { %v4039_v45 = vld [vmem:[#allocation5 + $0x5c0] sm:$0xf]  ;;  %v5030_v46 = vld [vmem:[#allocation5 + $0x5cc] sm:$0xf0]  ;;  %v3912_v55 = vor.u32 %v4998_v42, %v3911_v41  ;;  %1585 = vmatpush.bf16.msrb.mxu1 %v4056_v43  ;;  %v3356_v42 = vor.u32 %v4856_v34, %v3353_v35  ;;  %v3529_v34 = vld [vmem:[#allocation5 + $0x1d0] sm:$0xf0] }
  0x42   :  { %v4167_v47 = vld [vmem:[#allocation5 + $0x6c0] sm:$0xf]  ;;  %v5062_v49 = vld [vmem:[#allocation5 + $0x6cc] sm:$0xf0]  ;;  %1599 = vmatpush.bf16.msrb.mxu2 %v4184_v44  ;;  %v4040_v59 = vor.u32 %v5030_v46, %v4039_v45  ;;  %v4852_v46 = vld [vmem:[#allocation5 + $0x44] sm:$0xf] }
  0x43   :  { %v3283_v54 = vld [vmem:[#allocation2 + $0x8] sm:$0xf]  ;;  %v3895_v56 = vld [vmem:[#allocation5 + $0x4a0] sm:$0xf]  ;;  %v4168_v60 = vor.u32 %v5062_v49, %v4167_v47  ;;  %1613 = vmatpush.bf16.msrb.mxu3 %v3420_v48  ;;  %v3337_v47 = vld [vmem:[#allocation5 + $0x50] sm:$0xf0] }
  0x44   :  { %v4994_v61 = vld [vmem:[#allocation5 + $0x4ac] sm:$0xf0]  ;;  %v4023_v62 = vld [vmem:[#allocation5 + $0x5a0] sm:$0xf]  ;;  %v5498_v0 = vor.u32 %v4841_v58, %v3283_v54  ;;  %1572 = vmatpush.bf16.msrb.mxu0 %v3912_v55  ;;  %v3340_v54 = vor.u32 %v4852_v46, %v3337_v47  ;;  %v4932_v35 = vld [vmem:[#allocation5 + $0x2c4] sm:$0xf] }
  0x45   :  { %v5026_v63 = vld [vmem:[#allocation5 + $0x5ac] sm:$0xf0]  ;;  %v4151_v2 = vld [vmem:[#allocation5 + $0x6a0] sm:$0xf]  ;;  %v3896_v8 = vor.u32 %v4994_v61, %v3895_v56  ;;  %1586 = vmatpush.bf16.msrb.mxu1 %v4040_v59  ;;  %v4848_v59 = vld [vmem:[#allocation5 + $0x24] sm:$0xf] }
  0x46   :  { %v5058_v3 = vld [vmem:[#allocation5 + $0x6ac] sm:$0xf0]  ;;  %1551 = vmatmul.bf16.vlgmr.msra.gmra.mxu2 %v5498_v0  ;;  %v3879_v9 = vld [vmem:[#allocation5 + $0x480] sm:$0xf]  ;;  %v4024_v12 = vor.u32 %v5026_v63, %v4023_v62 }
  0x47   :  { %v4990_v10 = vld [vmem:[#allocation5 + $0x48c] sm:$0xf0]  ;;  %1600 = vmatpush.bf16.msrb.mxu2 %v4168_v60  ;;  %v4152_v13 = vor.u32 %v5058_v3, %v4151_v2  ;;  %v4007_v14 = vld [vmem:[#allocation5 + $0x580] sm:$0xf]  ;;  %1614 = vmatpush.bf16.msrb.mxu3 %v3404_v1  ;;  %v3321_v60 = vld [vmem:[#allocation5 + $0x30] sm:$0xf0] }
  0x48   :  { %v5022_v15 = vld [vmem:[#allocation5 + $0x58c] sm:$0xf0]  ;;  %v4135_v16 = vld [vmem:[#allocation5 + $0x680] sm:$0xf]  ;;  %1573 = vmatpush.bf16.msrb.mxu0 %v3896_v8  ;;  %v3880_v24 = vor.u32 %v4990_v10, %v3879_v9  ;;  %v3324_v8 = vor.u32 %v4848_v59, %v3321_v60  ;;  %v3305_v9 = vld [vmem:[#allocation5 + $0x10] sm:$0xf0] }
  0x49   :  { %v5054_v18 = vld [vmem:[#allocation5 + $0x68c] sm:$0xf0]  ;;  %1587 = vmatpush.bf16.msrb.mxu1 %v4024_v12  ;;  %v4008_v25 = vor.u32 %v5022_v15, %v4007_v14  ;;  %v3863_v27 = vld [vmem:[#allocation5 + $0x460] sm:$0xf]  ;;  %v4904_v10 = vld [vmem:[#allocation5 + $0x1e4] sm:$0xf] }
  0x4a   :  { %v3285_v20 = vld [vmem:[#allocation2 + $0x24] sm:$0xf0]  ;;  %v4136_v26 = vor.u32 %v5054_v18, %v4135_v16  ;;  %v3991_v29 = vld [vmem:[#allocation5 + $0x560] sm:$0xf]  ;;  %v3545_v12 = vld [vmem:[#allocation5 + $0x1f0] sm:$0xf0] }
  0x4b   :  { %v5505_v23 = vor.u32 %v4838_v19, %v3285_v20  ;;  %1601 = vmatpush.bf16.msrb.mxu2 %v4152_v13  ;;  %v4986_v28 = vld [vmem:[#allocation5 + $0x46c] sm:$0xf0]  ;;  %1615 = vmatpush.bf16.msrb.mxu3 %v3388_v17  ;;  %v4119_v32 = vld [vmem:[#allocation5 + $0x660] sm:$0xf]  ;;  %v4936_v13 = vld [vmem:[#allocation5 + $0x2e4] sm:$0xf] }
  0x4c   :  { %v5018_v31 = vld [vmem:[#allocation5 + $0x56c] sm:$0xf0]  ;;  %1574 = vmatpush.bf16.msrb.mxu0 %v3880_v24  ;;  %v3864_v36 = vor.u32 %v4986_v28, %v3863_v27  ;;  %v3847_v39 = vld [vmem:[#allocation5 + $0x440] sm:$0xf]  ;;  %v3673_v14 = vld [vmem:[#allocation5 + $0x2f0] sm:$0xf0]  ;;  %v3548_v27 = vor.u32 %v4904_v10, %v3545_v12 }
  0x4d   :  { %v5050_v33 = vld [vmem:[#allocation5 + $0x66c] sm:$0xf0]  ;;  %1565 = vmatmul.bf16.vlgmr.msra.gmra.mxu3 %v5505_v23  ;;  %1588 = vmatpush.bf16.msrb.mxu1 %v4008_v25  ;;  %v3992_v37 = vor.u32 %v5018_v31, %v3991_v29  ;;  %v3975_v41 = vld [vmem:[#allocation5 + $0x540] sm:$0xf]  ;;  %v4968_v15 = vld [vmem:[#allocation5 + $0x3e4] sm:$0xf]  ;;  %v3676_v31 = vor.u32 %v4936_v13, %v3673_v14 }
  0x4e   :  { %v4120_v38 = vor.u32 %v5050_v33, %v4119_v32  ;;  %v4982_v40 = vld [vmem:[#allocation5 + $0x44c] sm:$0xf0]  ;;  %v4103_v44 = vld [vmem:[#allocation5 + $0x640] sm:$0xf]  ;;  %v3801_v17 = vld [vmem:[#allocation5 + $0x3f0] sm:$0xf0] }
  0x4f   :  { %1602 = vmatpush.bf16.msrb.mxu2 %v4136_v26  ;;  %1616 = vmatpush.bf16.msrb.mxu3 %v3372_v30  ;;  %v5014_v43 = vld [vmem:[#allocation5 + $0x54c] sm:$0xf0]  ;;  %v3848_v48 = vor.u32 %v4982_v40, %v3847_v39  ;;  %v3831_v51 = vld [vmem:[#allocation5 + $0x420] sm:$0xf]  ;;  %v5000_v18 = vld [vmem:[#allocation5 + $0x4e4] sm:$0xf]  ;;  %v3308_v26 = vor.u32 %v4844_v7, %v3305_v9  ;;  %v3804_v32 = vor.u32 %v4968_v15, %v3801_v17 }
  0x50   :  { %v5046_v45 = vld [vmem:[#allocation5 + $0x64c] sm:$0xf0]  ;;  %1575 = vmatpush.bf16.msrb.mxu0 %v3864_v36  ;;  %v3976_v49 = vor.u32 %v5014_v43, %v3975_v41  ;;  %v3959_v53 = vld [vmem:[#allocation5 + $0x520] sm:$0xf]  ;;  %v3929_v19 = vld [vmem:[#allocation5 + $0x4f0] sm:$0xf0] }
  0x51   :  { %1589 = vmatpush.bf16.msrb.mxu1 %v3992_v37  ;;  %v4104_v50 = vor.u32 %v5046_v45, %v4103_v44  ;;  %v4978_v52 = vld [vmem:[#allocation5 + $0x42c] sm:$0xf0]  ;;  %v4087_v56 = vld [vmem:[#allocation5 + $0x620] sm:$0xf]  ;;  %v4842_v24 = vld [vmem:[#allocation2 + $0x28] sm:$0xf0]  ;;  %v3932_v36 = vor.u32 %v5000_v18, %v3929_v19 }
  0x52   :  { %v5010_v55 = vld [vmem:[#allocation5 + $0x52c] sm:$0xf0]  ;;  %v3815_v61 = vld [vmem:[#allocation5 + $0x400] sm:$0xf]  ;;  %v3832_v62 = vor.u32 %v4978_v52, %v3831_v51  ;;  %v4843_v28 = vld [vmem:[#allocation2 + $0x30] sm:$0xf0]  ;;  %v5508_v37 = vor.u32 %v4842_v24, %v3291_v22 }
  0x53   :  { %1603 = vmatpush.bf16.msrb.mxu2 %v4120_v38  ;;  %1617 = vmatpush.bf16.msrb.mxu3 %v3356_v42  ;;  %v5042_v58 = vld [vmem:[#allocation5 + $0x62c] sm:$0xf0]  ;;  %v3943_v1 = vld [vmem:[#allocation5 + $0x500] sm:$0xf]  ;;  %v3960_v3 = vor.u32 %v5010_v55, %v3959_v53  ;;  %v4839_v29 = vld [vmem:[#allocation2 + $0x14] sm:$0xf] }
  0x54   :  { %1576 = vmatpush.bf16.msrb.mxu0 %v3848_v48  ;;  %v4974_v63 = vld [vmem:[#allocation5 + $0x40c] sm:$0xf0]  ;;  %v4088_v4 = vor.u32 %v5042_v58, %v4087_v56  ;;  %v4071_v5 = vld [vmem:[#allocation5 + $0x600] sm:$0xf]  ;;  %v3293_v30 = vld [vmem:[#allocation2 + $0x2c] sm:$0xf0] }
  0x55   :  { %v5006_v2 = vld [vmem:[#allocation5 + $0x50c] sm:$0xf0]  ;;  %1590 = vmatpush.bf16.msrb.mxu1 %v3976_v49  ;;  %v3816_v16 = vor.u32 %v4974_v63, %v3815_v61  ;;  %v3299_v25 = vld [vmem:[#allocation2 + $0x18] sm:$0xf]  ;;  %v4900_v33 = vld [vmem:[#allocation5 + $0x1c4] sm:$0xf]  ;;  %v5512_v42 = vor.u32 %v4839_v29, %v3293_v30 }
  0x56   :  { %v5038_v6 = vld [vmem:[#allocation5 + $0x60c] sm:$0xf0]  ;;  %v3944_v20 = vor.u32 %v5006_v2, %v3943_v1  ;;  %v3657_v38 = vld [vmem:[#allocation5 + $0x2d0] sm:$0xf0]  ;;  %v4964_v39 = vld [vmem:[#allocation5 + $0x3c4] sm:$0xf]  ;;  %v5510_v41 = vor.u32 %v4843_v28, %v3299_v25  ;;  %v3532_v45 = vor.u32 %v4900_v33, %v3529_v34 }
  0x57   :  { %1604 = vmatpush.bf16.msrb.mxu2 %v4104_v50  ;;  %1618 = vmatpush.bf16.msrb.mxu3 %v3340_v54  ;;  %v4072_v21 = vor.u32 %v5038_v6, %v4071_v5  ;;  %v3785_v40 = vld [vmem:[#allocation5 + $0x3d0] sm:$0xf0]  ;;  %v4996_v43 = vld [vmem:[#allocation5 + $0x4c4] sm:$0xf]  ;;  %v3660_v46 = vor.u32 %v4932_v35, %v3657_v38 }
  0x58   :  { %1577 = vmatpush.bf16.msrb.mxu0 %v3832_v62  ;;  %v3913_v44 = vld [vmem:[#allocation5 + $0x4d0] sm:$0xf0]  ;;  %v3788_v47 = vor.u32 %v4964_v39, %v3785_v40  ;;  %v4896_v48 = vld [vmem:[#allocation5 + $0x1a4] sm:$0xf] }
  0x59   :  { %1591 = vmatpush.bf16.msrb.mxu1 %v3960_v3  ;;  %v3513_v49 = vld [vmem:[#allocation5 + $0x1b0] sm:$0xf0]  ;;  %v4928_v50 = vld [vmem:[#allocation5 + $0x2a4] sm:$0xf]  ;;  %v3916_v51 = vor.u32 %v4996_v43, %v3913_v44 }
  0x5a   :  { %v3641_v52 = vld [vmem:[#allocation5 + $0x2b0] sm:$0xf0]  ;;  %v4960_v53 = vld [vmem:[#allocation5 + $0x3a4] sm:$0xf]  ;;  %v3516_v58 = vor.u32 %v4896_v48, %v3513_v49 }
  0x5b   :  { %1605 = vmatpush.bf16.msrb.mxu2 %v4088_v4  ;;  %1619 = vmatpush.bf16.msrb.mxu3 %v3324_v8  ;;  %v3769_v54 = vld [vmem:[#allocation5 + $0x3b0] sm:$0xf0]  ;;  %v4992_v55 = vld [vmem:[#allocation5 + $0x4a4] sm:$0xf]  ;;  %v3644_v59 = vor.u32 %v4928_v50, %v3641_v52 }
  0x5c   :  { %1578 = vmatpush.bf16.msrb.mxu0 %v3816_v16  ;;  %v3897_v56 = vld [vmem:[#allocation5 + $0x4b0] sm:$0xf0]  ;;  %v3772_v60 = vor.u32 %v4960_v53, %v3769_v54  ;;  %v4892_v61 = vld [vmem:[#allocation5 + $0x184] sm:$0xf] }
  0x5d   :  { %1592 = vmatpush.bf16.msrb.mxu1 %v3944_v20  ;;  %v3497_v62 = vld [vmem:[#allocation5 + $0x190] sm:$0xf0]  ;;  %v4924_v63 = vld [vmem:[#allocation5 + $0x284] sm:$0xf]  ;;  %v3900_v1 = vor.u32 %v4992_v55, %v3897_v56 }
  0x5e   :  { %v3625_v2 = vld [vmem:[#allocation5 + $0x290] sm:$0xf0]  ;;  %v4956_v3 = vld [vmem:[#allocation5 + $0x384] sm:$0xf]  ;;  %v3500_v7 = vor.u32 %v4892_v61, %v3497_v62 }
  0x5f   :  { %1606 = vmatpush.bf16.msrb.mxu2 %v4072_v21  ;;  %1620 = vmatpush.bf16.msrb.mxu3 %v3308_v26  ;;  %v3753_v4 = vld [vmem:[#allocation5 + $0x390] sm:$0xf0]  ;;  %v4988_v5 = vld [vmem:[#allocation5 + $0x484] sm:$0xf]  ;;  %v3628_v8 = vor.u32 %v4924_v63, %v3625_v2 }
  0x60   :  { %1627 = vmatpush.bf16.msra.mxu0 %v3548_v27  ;;  %1593 = vmatmul.bf16.vlgmr.msrb.gmra.mxu1 %v5512_v42  ;;  %v3881_v6 = vld [vmem:[#allocation5 + $0x490] sm:$0xf0]  ;;  %v3756_v9 = vor.u32 %v4956_v3, %v3753_v4  ;;  %v4888_v10 = vld [vmem:[#allocation5 + $0x164] sm:$0xf]  ;;  %v3423_v3 = vld [vmem:[#allocation5 + $0xe8] sm:$0xf] }
  0x61   :  { %1641 = vmatpush.bf16.msra.mxu1 %v3676_v31  ;;  %1579 = vmatmul.bf16.vlgmr.msrb.gmra.mxu0 %v5508_v37  ;;  %v3481_v12 = vld [vmem:[#allocation5 + $0x170] sm:$0xf0]  ;;  %v4920_v13 = vld [vmem:[#allocation5 + $0x264] sm:$0xf]  ;;  %v3884_v14 = vor.u32 %v4988_v5, %v3881_v6  ;;  %v4875_v4 = vld [vmem:[#allocation5 + $0xf4] sm:$0xf0] }
  0x62   :  { %1607 = vmatmul.bf16.vlgmr.msrb.gmra.mxu2 %v5510_v41  ;;  %1621 = vmatmul.bf16.vlgmr.msrb.gmra.mxu3 %v5496_v57  ;;  %v3609_v15 = vld [vmem:[#allocation5 + $0x270] sm:$0xf0]  ;;  %v4952_v16 = vld [vmem:[#allocation5 + $0x364] sm:$0xf]  ;;  %v3484_v20 = vor.u32 %v4888_v10, %v3481_v12 }
  0x63   :  { %1655 = vmatpush.bf16.msra.mxu2 %v3804_v32  ;;  %1669 = vmatpush.bf16.msra.mxu3 %v3932_v36  ;;  %v3737_v17 = vld [vmem:[#allocation5 + $0x370] sm:$0xf0]  ;;  %v4984_v18 = vld [vmem:[#allocation5 + $0x464] sm:$0xf]  ;;  %v3612_v21 = vor.u32 %v4920_v13, %v3609_v15  ;;  %v3424_v13 = vor.u32 %v4875_v4, %v3423_v3 }
  0x64   :  { %1628 = vmatpush.bf16.msra.mxu0 %v3532_v45  ;;  %v3865_v19 = vld [vmem:[#allocation5 + $0x470] sm:$0xf0]  ;;  %v3740_v22 = vor.u32 %v4952_v16, %v3737_v17  ;;  %v4884_v24 = vld [vmem:[#allocation5 + $0x144] sm:$0xf] }
  0x65   :  { %1642 = vmatpush.bf16.msra.mxu1 %v3660_v46  ;;  %v3465_v25 = vld [vmem:[#allocation5 + $0x150] sm:$0xf0]  ;;  %v4916_v26 = vld [vmem:[#allocation5 + $0x244] sm:$0xf]  ;;  %v3868_v27 = vor.u32 %v4984_v18, %v3865_v19  ;;  %v3407_v19 = vld [vmem:[#allocation5 + $0xc8] sm:$0xf] }
  0x66   :  { %v3593_v28 = vld [vmem:[#allocation5 + $0x250] sm:$0xf0]  ;;  %v4948_v29 = vld [vmem:[#allocation5 + $0x344] sm:$0xf]  ;;  %v3468_v33 = vor.u32 %v4884_v24, %v3465_v25 }
  0x67   :  { %1656 = vmatpush.bf16.msra.mxu2 %v3788_v47  ;;  %1670 = vmatpush.bf16.msra.mxu3 %v3916_v51  ;;  %v3721_v30 = vld [vmem:[#allocation5 + $0x350] sm:$0xf0]  ;;  %v4980_v31 = vld [vmem:[#allocation5 + $0x444] sm:$0xf]  ;;  %v3596_v34 = vor.u32 %v4916_v26, %v3593_v28 }
  0x68   :  { %1629 = vmatpush.bf16.msra.mxu0 %v3516_v58  ;;  %v3849_v32 = vld [vmem:[#allocation5 + $0x450] sm:$0xf0]  ;;  %v3724_v35 = vor.u32 %v4948_v29, %v3721_v30  ;;  %v4880_v36 = vld [vmem:[#allocation5 + $0x124] sm:$0xf] }
  0x69   :  { %1643 = vmatpush.bf16.msra.mxu1 %v3644_v59  ;;  %v3449_v38 = vld [vmem:[#allocation5 + $0x130] sm:$0xf0]  ;;  %v4912_v39 = vld [vmem:[#allocation5 + $0x224] sm:$0xf]  ;;  %v3852_v40 = vor.u32 %v4980_v31, %v3849_v32  ;;  %v3391_v32 = vld [vmem:[#allocation5 + $0xa8] sm:$0xf] }
  0x6a   :  { %v3577_v43 = vld [vmem:[#allocation5 + $0x230] sm:$0xf0]  ;;  %v4944_v44 = vld [vmem:[#allocation5 + $0x324] sm:$0xf]  ;;  %v3452_v48 = vor.u32 %v4880_v36, %v3449_v38 }
  0x6b   :  { %1657 = vmatpush.bf16.msra.mxu2 %v3772_v60  ;;  %1671 = vmatpush.bf16.msra.mxu3 %v3900_v1  ;;  %v3705_v45 = vld [vmem:[#allocation5 + $0x330] sm:$0xf0]  ;;  %v4976_v46 = vld [vmem:[#allocation5 + $0x424] sm:$0xf]  ;;  %v3580_v51 = vor.u32 %v4912_v39, %v3577_v43 }
  0x6c   :  { %1630 = vmatpush.bf16.msra.mxu0 %v3500_v7  ;;  %v3833_v47 = vld [vmem:[#allocation5 + $0x430] sm:$0xf0]  ;;  %v4876_v49 = vld [vmem:[#allocation5 + $0x104] sm:$0xf]  ;;  %v3708_v52 = vor.u32 %v4944_v44, %v3705_v45  ;;  %v3551_v7 = vld [vmem:[#allocation5 + $0x1e8] sm:$0xf] }
  0x6d   :  { %1644 = vmatpush.bf16.msra.mxu1 %v3628_v8  ;;  %v3433_v50 = vld [vmem:[#allocation5 + $0x110] sm:$0xf0]  ;;  %v4908_v53 = vld [vmem:[#allocation5 + $0x204] sm:$0xf]  ;;  %v3836_v56 = vor.u32 %v4976_v46, %v3833_v47  ;;  %v4907_v8 = vld [vmem:[#allocation5 + $0x1f4] sm:$0xf0] }
  0x6e   :  { %v3561_v54 = vld [vmem:[#allocation5 + $0x210] sm:$0xf0]  ;;  %v4940_v55 = vld [vmem:[#allocation5 + $0x304] sm:$0xf]  ;;  %v3436_v1 = vor.u32 %v4876_v49, %v3433_v50  ;;  %v3552_v17 = vor.u32 %v4907_v8, %v3551_v7  ;;  %v3375_v47 = vld [vmem:[#allocation5 + $0x88] sm:$0xf] }
  0x6f   :  { %1658 = vmatpush.bf16.msra.mxu2 %v3756_v9  ;;  %1672 = vmatpush.bf16.msra.mxu3 %v3884_v14  ;;  %v3689_v58 = vld [vmem:[#allocation5 + $0x310] sm:$0xf0]  ;;  %v4972_v59 = vld [vmem:[#allocation5 + $0x404] sm:$0xf]  ;;  %v3564_v5 = vor.u32 %v4908_v53, %v3561_v54  ;;  %v3503_v49 = vld [vmem:[#allocation5 + $0x188] sm:$0xf] }
  0x70   :  { %1631 = vmatpush.bf16.msra.mxu0 %v3484_v20  ;;  %v3817_v60 = vld [vmem:[#allocation5 + $0x410] sm:$0xf0]  ;;  %v5032_v61 = vld [vmem:[#allocation5 + $0x5e4] sm:$0xf]  ;;  %v3692_v6 = vor.u32 %v4940_v55, %v3689_v58  ;;  %v4871_v20 = vld [vmem:[#allocation5 + $0xd4] sm:$0xf0] }
  0x71   :  { %1645 = vmatpush.bf16.msra.mxu1 %v3612_v21  ;;  %v4057_v62 = vld [vmem:[#allocation5 + $0x5f0] sm:$0xf0]  ;;  %v5064_v63 = vld [vmem:[#allocation5 + $0x6e4] sm:$0xf]  ;;  %v3820_v9 = vor.u32 %v4972_v59, %v3817_v60  ;;  %v3535_v21 = vld [vmem:[#allocation5 + $0x1c8] sm:$0xf]  ;;  %v3408_v26 = vor.u32 %v4871_v20, %v3407_v19 }
  0x72   :  { %v4185_v2 = vld [vmem:[#allocation5 + $0x6f0] sm:$0xf0]  ;;  %v4060_v10 = vor.u32 %v5032_v61, %v4057_v62  ;;  %v5028_v14 = vld [vmem:[#allocation5 + $0x5c4] sm:$0xf]  ;;  %v4895_v50 = vld [vmem:[#allocation5 + $0x194] sm:$0xf0] }
  0x73   :  { %1659 = vmatpush.bf16.msra.mxu2 %v3740_v22  ;;  %1673 = vmatpush.bf16.msra.mxu3 %v3868_v27  ;;  %v4188_v12 = vor.u32 %v5064_v63, %v4185_v2  ;;  %v4041_v15 = vld [vmem:[#allocation5 + $0x5d0] sm:$0xf0]  ;;  %v5060_v16 = vld [vmem:[#allocation5 + $0x6c4] sm:$0xf]  ;;  %v4903_v22 = vld [vmem:[#allocation5 + $0x1d4] sm:$0xf0]  ;;  %v3504_v58 = vor.u32 %v4895_v50, %v3503_v49 }
  0x74   :  { %1632 = vmatpush.bf16.msra.mxu0 %v3468_v33  ;;  %v4169_v18 = vld [vmem:[#allocation5 + $0x6d0] sm:$0xf0]  ;;  %v4044_v24 = vor.u32 %v5028_v14, %v4041_v15  ;;  %v5024_v27 = vld [vmem:[#allocation5 + $0x5a4] sm:$0xf]  ;;  %v3536_v30 = vor.u32 %v4903_v22, %v3535_v21  ;;  %v4867_v33 = vld [vmem:[#allocation5 + $0xb4] sm:$0xf0] }
  0x75   :  { %1646 = vmatpush.bf16.msra.mxu1 %v3596_v34  ;;  %v4172_v25 = vor.u32 %v5060_v16, %v4169_v18  ;;  %v4025_v28 = vld [vmem:[#allocation5 + $0x5b0] sm:$0xf0]  ;;  %v5056_v29 = vld [vmem:[#allocation5 + $0x6a4] sm:$0xf]  ;;  %v3519_v34 = vld [vmem:[#allocation5 + $0x1a8] sm:$0xf]  ;;  %v3392_v39 = vor.u32 %v4867_v33, %v3391_v32 }
  0x76   :  { %v4153_v31 = vld [vmem:[#allocation5 + $0x6b0] sm:$0xf0]  ;;  %v4028_v36 = vor.u32 %v5024_v27, %v4025_v28  ;;  %v5052_v44 = vld [vmem:[#allocation5 + $0x684] sm:$0xf]  ;;  %v3359_v60 = vld [vmem:[#allocation5 + $0x68] sm:$0xf] }
  0x77   :  { %1660 = vmatpush.bf16.msra.mxu2 %v3724_v35  ;;  %1674 = vmatpush.bf16.msra.mxu3 %v3852_v40  ;;  %v4899_v35 = vld [vmem:[#allocation5 + $0x1b4] sm:$0xf0]  ;;  %v4156_v38 = vor.u32 %v5056_v29, %v4153_v31  ;;  %v5020_v40 = vld [vmem:[#allocation5 + $0x584] sm:$0xf]  ;;  %v4009_v43 = vld [vmem:[#allocation5 + $0x590] sm:$0xf0] }
  0x78   :  { %1633 = vmatpush.bf16.msra.mxu0 %v3452_v48  ;;  %v3520_v45 = vor.u32 %v4899_v35, %v3519_v34  ;;  %v4137_v46 = vld [vmem:[#allocation5 + $0x690] sm:$0xf0]  ;;  %v4863_v48 = vld [vmem:[#allocation5 + $0x94] sm:$0xf0]  ;;  %v5016_v54 = vld [vmem:[#allocation5 + $0x564] sm:$0xf] }
  0x79   :  { %1647 = vmatpush.bf16.msra.mxu1 %v3580_v51  ;;  %v4012_v51 = vor.u32 %v5020_v40, %v4009_v43  ;;  %v3376_v53 = vor.u32 %v4863_v48, %v3375_v47  ;;  %v3993_v55 = vld [vmem:[#allocation5 + $0x570] sm:$0xf0]  ;;  %v4859_v61 = vld [vmem:[#allocation5 + $0x74] sm:$0xf0]  ;;  %v3487_v62 = vld [vmem:[#allocation5 + $0x168] sm:$0xf] }
  0x7a   :  { %v4121_v59 = vld [vmem:[#allocation5 + $0x670] sm:$0xf0]  ;;  %v4891_v63 = vld [vmem:[#allocation5 + $0x174] sm:$0xf0]  ;;  %v3360_v3 = vor.u32 %v4859_v61, %v3359_v60  ;;  %v5012_v4 = vld [vmem:[#allocation5 + $0x544] sm:$0xf] }
  0x7b   :  { %1661 = vmatpush.bf16.msra.mxu2 %v3708_v52  ;;  %1675 = vmatpush.bf16.msra.mxu3 %v3836_v56  ;;  %v4140_v52 = vor.u32 %v5052_v44, %v4137_v46  ;;  %v5048_v56 = vld [vmem:[#allocation5 + $0x664] sm:$0xf]  ;;  %v3488_v7 = vor.u32 %v4891_v63, %v3487_v62  ;;  %v4105_v8 = vld [vmem:[#allocation5 + $0x650] sm:$0xf0]  ;;  %v3327_v22 = vld [vmem:[#allocation5 + $0x28] sm:$0xf] }
  0x7c   :  { %1634 = vmatpush.bf16.msra.mxu0 %v3436_v1  ;;  %v3996_v1 = vor.u32 %v5016_v54, %v3993_v55  ;;  %v4124_v2 = vor.u32 %v5048_v56, %v4121_v59  ;;  %v3961_v18 = vld [vmem:[#allocation5 + $0x530] sm:$0xf0]  ;;  %v5040_v19 = vld [vmem:[#allocation5 + $0x624] sm:$0xf]  ;;  %v3311_v34 = vld [vmem:[#allocation5 + $0x8] sm:$0xf] }
  0x7d   :  { %1648 = vmatpush.bf16.msra.mxu1 %v3564_v5  ;;  %v3977_v5 = vld [vmem:[#allocation5 + $0x550] sm:$0xf0]  ;;  %v5004_v28 = vld [vmem:[#allocation5 + $0x504] sm:$0xf]  ;;  %v3679_v40 = vld [vmem:[#allocation5 + $0x2e8] sm:$0xf] }
  0x7e   :  { %v3980_v14 = vor.u32 %v5012_v4, %v3977_v5  ;;  %v4089_v21 = vld [vmem:[#allocation5 + $0x630] sm:$0xf0]  ;;  %v5036_v32 = vld [vmem:[#allocation5 + $0x604] sm:$0xf]  ;;  %v4939_v43 = vld [vmem:[#allocation5 + $0x2f4] sm:$0xf0] }
  0x7f   :  { %1662 = vmatpush.bf16.msra.mxu2 %v3692_v6  ;;  %1676 = vmatpush.bf16.msra.mxu3 %v3820_v9  ;;  %v5044_v6 = vld [vmem:[#allocation5 + $0x644] sm:$0xf]  ;;  %v3343_v9 = vld [vmem:[#allocation5 + $0x48] sm:$0xf]  ;;  %v3945_v29 = vld [vmem:[#allocation5 + $0x510] sm:$0xf0]  ;;  %v3680_v54 = vor.u32 %v4939_v43, %v3679_v40 }
  0x80   :  { %1683 = vmatpush.bf16.msrb.mxu0 %v4060_v10  ;;  %1649 = vmatmul.bf16.vlgmr.msra.gmra.mxu1 %v5498_v0  ;;  %v4855_v10 = vld [vmem:[#allocation5 + $0x54] sm:$0xf0]  ;;  %v4108_v15 = vor.u32 %v5044_v6, %v4105_v8  ;;  %v4073_v33 = vld [vmem:[#allocation5 + $0x610] sm:$0xf0]  ;;  %v3807_v44 = vld [vmem:[#allocation5 + $0x3e8] sm:$0xf] }
  0x81   :  { %1697 = vmatpush.bf16.msrb.mxu1 %v4188_v12  ;;  %1635 = vmatmul.bf16.vlgmr.msra.gmra.mxu0 %v5502_v11  ;;  %v3471_v12 = vld [vmem:[#allocation5 + $0x148] sm:$0xf]  ;;  %v3344_v16 = vor.u32 %v4855_v10, %v3343_v9  ;;  %v4971_v46 = vld [vmem:[#allocation5 + $0x3f4] sm:$0xf0]  ;;  %v4076_v49 = vor.u32 %v5036_v32, %v4073_v33 }
  0x82   :  { %1663 = vmatmul.bf16.vlgmr.msra.gmra.mxu2 %v5505_v23  ;;  %1677 = vmatmul.bf16.vlgmr.msra.gmra.mxu3 %v5508_v37  ;;  %v3935_v47 = vld [vmem:[#allocation5 + $0x4e8] sm:$0xf]  ;;  %v5003_v48 = vld [vmem:[#allocation5 + $0x4f4] sm:$0xf0]  ;;  %v3808_v55 = vor.u32 %v4971_v46, %v3807_v44 }
  0x83   :  { %1711 = vmatpush.bf16.msrb.mxu2 %v3424_v13  ;;  %1725 = vmatpush.bf16.msrb.mxu3 %v3552_v17  ;;  %v4887_v13 = vld [vmem:[#allocation5 + $0x154] sm:$0xf0]  ;;  %v5008_v17 = vld [vmem:[#allocation5 + $0x524] sm:$0xf]  ;;  %v3936_v56 = vor.u32 %v5003_v48, %v3935_v47  ;;  %v3791_v60 = vld [vmem:[#allocation5 + $0x3c8] sm:$0xf] }
  0x84   :  { %1684 = vmatpush.bf16.msrb.mxu0 %v4044_v24  ;;  %v3472_v20 = vor.u32 %v4887_v13, %v3471_v12  ;;  %v4851_v24 = vld [vmem:[#allocation5 + $0x34] sm:$0xf0]  ;;  %v3964_v27 = vor.u32 %v5008_v17, %v3961_v18  ;;  %v3919_v63 = vld [vmem:[#allocation5 + $0x4c8] sm:$0xf] }
  0x85   :  { %1698 = vmatpush.bf16.msrb.mxu1 %v4172_v25  ;;  %v3455_v25 = vld [vmem:[#allocation5 + $0x128] sm:$0xf]  ;;  %v3328_v31 = vor.u32 %v4851_v24, %v3327_v22  ;;  %v4935_v59 = vld [vmem:[#allocation5 + $0x2d4] sm:$0xf0] }
  0x86   :  { %v4967_v62 = vld [vmem:[#allocation5 + $0x3d4] sm:$0xf0]  ;;  %v3775_v9 = vld [vmem:[#allocation5 + $0x3a8] sm:$0xf] }
  0x87   :  { %1712 = vmatpush.bf16.msrb.mxu2 %v3408_v26  ;;  %1726 = vmatpush.bf16.msrb.mxu3 %v3536_v30  ;;  %v4883_v26 = vld [vmem:[#allocation5 + $0x134] sm:$0xf0]  ;;  %v4092_v30 = vor.u32 %v5040_v19, %v4089_v21  ;;  %v3792_v5 = vor.u32 %v4967_v62, %v3791_v60  ;;  %v3903_v13 = vld [vmem:[#allocation5 + $0x4a8] sm:$0xf] }
  0x88   :  { %1685 = vmatpush.bf16.msrb.mxu0 %v4028_v36  ;;  %v3456_v35 = vor.u32 %v4883_v26, %v3455_v25  ;;  %v4847_v36 = vld [vmem:[#allocation5 + $0x14] sm:$0xf0]  ;;  %v3759_v22 = vld [vmem:[#allocation5 + $0x388] sm:$0xf] }
  0x89   :  { %1699 = vmatpush.bf16.msrb.mxu1 %v4156_v38  ;;  %v3439_v38 = vld [vmem:[#allocation5 + $0x108] sm:$0xf]  ;;  %v3312_v50 = vor.u32 %v4847_v36, %v3311_v34  ;;  %v4931_v8 = vld [vmem:[#allocation5 + $0x2b4] sm:$0xf0] }
  0x8a   :  { %v4963_v12 = vld [vmem:[#allocation5 + $0x3b4] sm:$0xf0]  ;;  %v3887_v26 = vld [vmem:[#allocation5 + $0x488] sm:$0xf] }
  0x8b   :  { %1713 = vmatpush.bf16.msrb.mxu2 %v3392_v39  ;;  %1727 = vmatpush.bf16.msrb.mxu3 %v3520_v45  ;;  %v4879_v39 = vld [vmem:[#allocation5 + $0x114] sm:$0xf0]  ;;  %v3948_v45 = vor.u32 %v5004_v28, %v3945_v29  ;;  %v3776_v18 = vor.u32 %v4963_v12, %v3775_v9  ;;  %v4015_v28 = vld [vmem:[#allocation5 + $0x588] sm:$0xf] }
  0x8c   :  { %1686 = vmatpush.bf16.msrb.mxu0 %v4012_v51  ;;  %v4063_v51 = vld [vmem:[#allocation5 + $0x5e8] sm:$0xf]  ;;  %v4927_v21 = vld [vmem:[#allocation5 + $0x294] sm:$0xf0] }
  0x8d   :  { %1700 = vmatpush.bf16.msrb.mxu1 %v4140_v52  ;;  %v5035_v52 = vld [vmem:[#allocation5 + $0x5f4] sm:$0xf0]  ;;  %v3615_v33 = vld [vmem:[#allocation5 + $0x268] sm:$0xf] }
  0x8e   :  { %v4064_v61 = vor.u32 %v5035_v52, %v4063_v51  ;;  %v4959_v25 = vld [vmem:[#allocation5 + $0x394] sm:$0xf0]  ;;  %v3999_v43 = vld [vmem:[#allocation5 + $0x568] sm:$0xf] }
  0x8f   :  { %1714 = vmatpush.bf16.msrb.mxu2 %v3376_v53  ;;  %1728 = vmatpush.bf16.msrb.mxu3 %v3504_v58  ;;  %v3440_v53 = vor.u32 %v4879_v39, %v3439_v38  ;;  %v3663_v58 = vld [vmem:[#allocation5 + $0x2c8] sm:$0xf]  ;;  %v5023_v29 = vld [vmem:[#allocation5 + $0x594] sm:$0xf0] }
  0x90   :  { %1687 = vmatpush.bf16.msrb.mxu0 %v3996_v1  ;;  %v4999_v1 = vld [vmem:[#allocation5 + $0x4d4] sm:$0xf0]  ;;  %v3664_v4 = vor.u32 %v4935_v59, %v3663_v58  ;;  %v4016_v36 = vor.u32 %v5023_v29, %v4015_v28  ;;  %v3871_v39 = vld [vmem:[#allocation5 + $0x468] sm:$0xf] }
  0x91   :  { %1701 = vmatpush.bf16.msrb.mxu1 %v4124_v2  ;;  %v4047_v2 = vld [vmem:[#allocation5 + $0x5c8] sm:$0xf]  ;;  %v3920_v6 = vor.u32 %v4999_v1, %v3919_v63  ;;  %v4923_v34 = vld [vmem:[#allocation5 + $0x274] sm:$0xf0] }
  0x92   :  { %v4955_v38 = vld [vmem:[#allocation5 + $0x374] sm:$0xf0]  ;;  %v3599_v48 = vld [vmem:[#allocation5 + $0x248] sm:$0xf] }
  0x93   :  { %1715 = vmatpush.bf16.msrb.mxu2 %v3360_v3  ;;  %1729 = vmatpush.bf16.msrb.mxu3 %v3488_v7  ;;  %v5031_v3 = vld [vmem:[#allocation5 + $0x5d4] sm:$0xf0]  ;;  %v3647_v7 = vld [vmem:[#allocation5 + $0x2a8] sm:$0xf] }
  0x94   :  { %1688 = vmatpush.bf16.msrb.mxu0 %v3980_v14  ;;  %v4048_v10 = vor.u32 %v5031_v3, %v4047_v2  ;;  %v4995_v14 = vld [vmem:[#allocation5 + $0x4b4] sm:$0xf0]  ;;  %v3648_v17 = vor.u32 %v4931_v8, %v3647_v7  ;;  %v3711_v63 = vld [vmem:[#allocation5 + $0x328] sm:$0xf] }
  0x95   :  { %1702 = vmatpush.bf16.msrb.mxu1 %v4108_v15  ;;  %v4031_v15 = vld [vmem:[#allocation5 + $0x5a8] sm:$0xf]  ;;  %v3904_v19 = vor.u32 %v4995_v14, %v3903_v13  ;;  %v4987_v40 = vld [vmem:[#allocation5 + $0x474] sm:$0xf0] }
  0x96   :  { %v5019_v44 = vld [vmem:[#allocation5 + $0x574] sm:$0xf0]  ;;  %v3872_v47 = vor.u32 %v4987_v40, %v3871_v39  ;;  %v3839_v3 = vld [vmem:[#allocation5 + $0x428] sm:$0xf]  ;;  %v4869_v39 = vld [vmem:[#allocation5 + $0xcc] sm:$0xf] }
  0x97   :  { %1716 = vmatpush.bf16.msrb.mxu2 %v3344_v16  ;;  %1730 = vmatpush.bf16.msrb.mxu3 %v3472_v20  ;;  %v5027_v16 = vld [vmem:[#allocation5 + $0x5b4] sm:$0xf0]  ;;  %v3631_v20 = vld [vmem:[#allocation5 + $0x288] sm:$0xf]  ;;  %v4000_v51 = vor.u32 %v5019_v44, %v3999_v43  ;;  %v3409_v43 = vld [vmem:[#allocation5 + $0xd8] sm:$0xf0] }
  0x98   :  { %1689 = vmatpush.bf16.msrb.mxu0 %v3964_v27  ;;  %v4032_v24 = vor.u32 %v5027_v16, %v4031_v15  ;;  %v4991_v27 = vld [vmem:[#allocation5 + $0x494] sm:$0xf0]  ;;  %v3567_v8 = vld [vmem:[#allocation5 + $0x208] sm:$0xf]  ;;  %v4901_v44 = vld [vmem:[#allocation5 + $0x1cc] sm:$0xf] }
  0x99   :  { %1703 = vmatpush.bf16.msrb.mxu1 %v4092_v30  ;;  %v3632_v30 = vor.u32 %v4927_v21, %v3631_v20  ;;  %v3888_v32 = vor.u32 %v4991_v27, %v3887_v26  ;;  %v4951_v52 = vld [vmem:[#allocation5 + $0x354] sm:$0xf0]  ;;  %v3695_v13 = vld [vmem:[#allocation5 + $0x308] sm:$0xf]  ;;  %v4905_v26 = vld [vmem:[#allocation5 + $0x1ec] sm:$0xf] }
  0x9a   :  { %v4915_v62 = vld [vmem:[#allocation5 + $0x234] sm:$0xf0]  ;;  %v3823_v15 = vld [vmem:[#allocation5 + $0x408] sm:$0xf]  ;;  %v3553_v27 = vld [vmem:[#allocation5 + $0x1f8] sm:$0xf0] }
  0x9b   :  { %1717 = vmatpush.bf16.msrb.mxu2 %v3328_v31  ;;  %1731 = vmatpush.bf16.msrb.mxu3 %v3456_v35  ;;  %v3760_v31 = vor.u32 %v4959_v25, %v3759_v22  ;;  %v3743_v35 = vld [vmem:[#allocation5 + $0x368] sm:$0xf]  ;;  %v4947_v2 = vld [vmem:[#allocation5 + $0x334] sm:$0xf0]  ;;  %v4873_v22 = vld [vmem:[#allocation5 + $0xec] sm:$0xf] }
  0x9c   :  { %1690 = vmatpush.bf16.msrb.mxu0 %v3948_v45  ;;  %v3616_v45 = vor.u32 %v4923_v34, %v3615_v33  ;;  %v3744_v46 = vor.u32 %v4955_v38, %v3743_v35  ;;  %v4911_v9 = vld [vmem:[#allocation5 + $0x214] sm:$0xf0]  ;;  %v4191_v20 = vld [vmem:[#allocation5 + $0x6e8] sm:$0xf]  ;;  %v3425_v25 = vld [vmem:[#allocation5 + $0xf8] sm:$0xf0]  ;;  %v3556_v35 = vor.u32 %v4905_v26, %v3553_v27 }
  0x9d   :  { %1704 = vmatpush.bf16.msrb.mxu1 %v4076_v49  ;;  %v4919_v49 = vld [vmem:[#allocation5 + $0x254] sm:$0xf0]  ;;  %v3428_v34 = vor.u32 %v4873_v22, %v3425_v25  ;;  %v3617_v22 = vld [vmem:[#allocation5 + $0x278] sm:$0xf0]  ;;  %v4111_v27 = vld [vmem:[#allocation5 + $0x648] sm:$0xf] }
  0x9e   :  { %v3600_v58 = vor.u32 %v4919_v49, %v3599_v48  ;;  %v4943_v14 = vld [vmem:[#allocation5 + $0x314] sm:$0xf0]  ;;  %v3412_v49 = vor.u32 %v4869_v39, %v3409_v43 }
  0x9f   :  { %1718 = vmatpush.bf16.msrb.mxu2 %v3312_v50  ;;  %1732 = vmatpush.bf16.msrb.mxu3 %v3440_v53  ;;  %v3727_v50 = vld [vmem:[#allocation5 + $0x348] sm:$0xf]  ;;  %v5067_v21 = vld [vmem:[#allocation5 + $0x6f4] sm:$0xf0]  ;;  %v3696_v28 = vor.u32 %v4943_v14, %v3695_v13 }
  0xa0   :  { %1739 = vmatpush.bf16.msra.mxu0 %v3680_v54  ;;  %1705 = vmatmul.bf16.vlgmr.msrb.gmra.mxu1 %v5510_v41  ;;  %v3855_v53 = vld [vmem:[#allocation5 + $0x448] sm:$0xf]  ;;  %v4983_v54 = vld [vmem:[#allocation5 + $0x454] sm:$0xf0]  ;;  %v3728_v59 = vor.u32 %v4951_v52, %v3727_v50  ;;  %v4192_v33 = vor.u32 %v5067_v21, %v4191_v20  ;;  %v3489_v20 = vld [vmem:[#allocation5 + $0x178] sm:$0xf0] }
  0xa1   :  { %1753 = vmatpush.bf16.msra.mxu1 %v3808_v55  ;;  %1691 = vmatmul.bf16.vlgmr.msrb.gmra.mxu0 %v5512_v42  ;;  %v3983_v55 = vld [vmem:[#allocation5 + $0x548] sm:$0xf]  ;;  %v3856_v60 = vor.u32 %v4983_v54, %v3855_v53  ;;  %v5063_v38 = vld [vmem:[#allocation5 + $0x6d4] sm:$0xf0]  ;;  %v4865_v53 = vld [vmem:[#allocation5 + $0xac] sm:$0xf] }
  0xa2   :  { %1719 = vmatmul.bf16.vlgmr.msrb.gmra.mxu2 %v5496_v57  ;;  %1733 = vmatmul.bf16.vlgmr.msrb.gmra.mxu3 %v5502_v11  ;;  %v5059_v52 = vld [vmem:[#allocation5 + $0x6b4] sm:$0xf0]  ;;  %v4127_v14 = vld [vmem:[#allocation5 + $0x668] sm:$0xf]  ;;  %v4921_v21 = vld [vmem:[#allocation5 + $0x26c] sm:$0xf] }
  0xa3   :  { %1767 = vmatpush.bf16.msra.mxu2 %v3936_v56  ;;  %1781 = vmatpush.bf16.msra.mxu3 %v4064_v61  ;;  %v5015_v56 = vld [vmem:[#allocation5 + $0x554] sm:$0xf0]  ;;  %v3583_v61 = vld [vmem:[#allocation5 + $0x228] sm:$0xf] }
  0xa4   :  { %1740 = vmatpush.bf16.msra.mxu0 %v3664_v4  ;;  %v3984_v1 = vor.u32 %v5015_v56, %v3983_v55  ;;  %v4979_v4 = vld [vmem:[#allocation5 + $0x434] sm:$0xf0]  ;;  %v3584_v7 = vor.u32 %v4915_v62, %v3583_v61  ;;  %v3393_v55 = vld [vmem:[#allocation5 + $0xb8] sm:$0xf0]  ;;  %v4897_v56 = vld [vmem:[#allocation5 + $0x1ac] sm:$0xf] }
  0xa5   :  { %1754 = vmatpush.bf16.msra.mxu1 %v3792_v5  ;;  %v3967_v5 = vld [vmem:[#allocation5 + $0x528] sm:$0xf]  ;;  %v3840_v12 = vor.u32 %v4979_v4, %v3839_v3  ;;  %v3396_v62 = vor.u32 %v4865_v53, %v3393_v55  ;;  %v4861_v3 = vld [vmem:[#allocation5 + $0x8c] sm:$0xf]  ;;  %v5043_v43 = vld [vmem:[#allocation5 + $0x634] sm:$0xf0] }
  0xa6   :  { %v5039_v53 = vld [vmem:[#allocation5 + $0x614] sm:$0xf0] }
  0xa7   :  { %1768 = vmatpush.bf16.msra.mxu2 %v3920_v6  ;;  %1782 = vmatpush.bf16.msra.mxu3 %v4048_v10  ;;  %v5011_v6 = vld [vmem:[#allocation5 + $0x534] sm:$0xf0]  ;;  %v3712_v10 = vor.u32 %v4947_v2, %v3711_v63 }
  0xa8   :  { %1741 = vmatpush.bf16.msra.mxu0 %v3648_v17  ;;  %v3968_v16 = vor.u32 %v5011_v6, %v3967_v5  ;;  %v4975_v17 = vld [vmem:[#allocation5 + $0x414] sm:$0xf0]  ;;  %v3377_v5 = vld [vmem:[#allocation5 + $0x98] sm:$0xf0]  ;;  %v4893_v6 = vld [vmem:[#allocation5 + $0x18c] sm:$0xf] }
  0xa9   :  { %1755 = vmatpush.bf16.msra.mxu1 %v3776_v18  ;;  %v3951_v18 = vld [vmem:[#allocation5 + $0x508] sm:$0xf]  ;;  %v3824_v29 = vor.u32 %v4975_v17, %v3823_v15  ;;  %v5055_v2 = vld [vmem:[#allocation5 + $0x694] sm:$0xf0] }
  0xaa   :  { %v5051_v15 = vld [vmem:[#allocation5 + $0x674] sm:$0xf0] }
  0xab   :  { %1769 = vmatpush.bf16.msra.mxu2 %v3904_v19  ;;  %1783 = vmatpush.bf16.msra.mxu3 %v4032_v24  ;;  %v5007_v19 = vld [vmem:[#allocation5 + $0x514] sm:$0xf0]  ;;  %v3568_v24 = vor.u32 %v4911_v9, %v3567_v8  ;;  %v4925_v8 = vld [vmem:[#allocation5 + $0x28c] sm:$0xf]  ;;  %v3633_v9 = vld [vmem:[#allocation5 + $0x298] sm:$0xf0] }
  0xac   :  { %1742 = vmatpush.bf16.msra.mxu0 %v3632_v30  ;;  %v4937_v30 = vld [vmem:[#allocation5 + $0x2ec] sm:$0xf]  ;;  %v3636_v17 = vor.u32 %v4925_v8, %v3633_v9 }
  0xad   :  { %1756 = vmatpush.bf16.msra.mxu1 %v3760_v31  ;;  %v3681_v31 = vld [vmem:[#allocation5 + $0x2f8] sm:$0xf0] }
  0xae   :  { %v3684_v40 = vor.u32 %v4937_v30, %v3681_v31  ;;  %v3620_v30 = vor.u32 %v4921_v21, %v3617_v22  ;;  %v3345_v31 = vld [vmem:[#allocation5 + $0x58] sm:$0xf0]  ;;  %v5029_v22 = vld [vmem:[#allocation5 + $0x5cc] sm:$0xf] }
  0xaf   :  { %1770 = vmatpush.bf16.msra.mxu2 %v3888_v32  ;;  %1784 = vmatpush.bf16.msra.mxu3 %v4016_v36  ;;  %v3952_v32 = vor.u32 %v5007_v19, %v3951_v18  ;;  %v4175_v36 = vld [vmem:[#allocation5 + $0x6c8] sm:$0xf]  ;;  %v3361_v18 = vld [vmem:[#allocation5 + $0x78] sm:$0xf0]  ;;  %v4889_v19 = vld [vmem:[#allocation5 + $0x16c] sm:$0xf] }
  0xb0   :  { %1743 = vmatpush.bf16.msra.mxu0 %v3616_v45  ;;  %v3537_v45 = vld [vmem:[#allocation5 + $0x1d8] sm:$0xf0]  ;;  %v4176_v48 = vor.u32 %v5063_v38, %v4175_v36  ;;  %v3492_v26 = vor.u32 %v4889_v19, %v3489_v20  ;;  %v4997_v19 = vld [vmem:[#allocation5 + $0x4cc] sm:$0xf] }
  0xb1   :  { %1757 = vmatpush.bf16.msra.mxu1 %v3744_v46  ;;  %v4933_v46 = vld [vmem:[#allocation5 + $0x2cc] sm:$0xf]  ;;  %v3540_v50 = vor.u32 %v4901_v44, %v3537_v45  ;;  %v3921_v21 = vld [vmem:[#allocation5 + $0x4d8] sm:$0xf0] }
  0xb2   :  { %v4849_v44 = vld [vmem:[#allocation5 + $0x2c] sm:$0xf] }
  0xb3   :  { %1771 = vmatpush.bf16.msra.mxu2 %v3872_v47  ;;  %1785 = vmatpush.bf16.msra.mxu3 %v4000_v51  ;;  %v3665_v47 = vld [vmem:[#allocation5 + $0x2d8] sm:$0xf0]  ;;  %v4159_v51 = vld [vmem:[#allocation5 + $0x6a8] sm:$0xf] }
  0xb4   :  { %1744 = vmatpush.bf16.msra.mxu0 %v3600_v58  ;;  %v3668_v54 = vor.u32 %v4933_v46, %v3665_v47  ;;  %v3521_v58 = vld [vmem:[#allocation5 + $0x1b8] sm:$0xf0]  ;;  %v4160_v61 = vor.u32 %v5059_v52, %v4159_v51  ;;  %v4881_v47 = vld [vmem:[#allocation5 + $0x12c] sm:$0xf]  ;;  %v4079_v52 = vld [vmem:[#allocation5 + $0x608] sm:$0xf] }
  0xb5   :  { %1758 = vmatpush.bf16.msra.mxu1 %v3728_v59  ;;  %v4929_v59 = vld [vmem:[#allocation5 + $0x2ac] sm:$0xf]  ;;  %v3524_v63 = vor.u32 %v4897_v56, %v3521_v58  ;;  %v3329_v46 = vld [vmem:[#allocation5 + $0x38] sm:$0xf0] }
  0xb6   :  { %v4845_v56 = vld [vmem:[#allocation5 + $0xc] sm:$0xf]  ;;  %v3313_v58 = vld [vmem:[#allocation5 + $0x18] sm:$0xf0] }
  0xb7   :  { %1772 = vmatpush.bf16.msra.mxu2 %v3856_v60  ;;  %1786 = vmatpush.bf16.msra.mxu3 %v3984_v1  ;;  %v3649_v60 = vld [vmem:[#allocation5 + $0x2b8] sm:$0xf0]  ;;  %v4143_v1 = vld [vmem:[#allocation5 + $0x688] sm:$0xf]  ;;  %v3316_v8 = vor.u32 %v4845_v56, %v3313_v58  ;;  %v4985_v56 = vld [vmem:[#allocation5 + $0x46c] sm:$0xf] }
  0xb8   :  { %1745 = vmatpush.bf16.msra.mxu0 %v3584_v7  ;;  %v3652_v4 = vor.u32 %v4929_v59, %v3649_v60  ;;  %v3505_v7 = vld [vmem:[#allocation5 + $0x198] sm:$0xf0]  ;;  %v4877_v59 = vld [vmem:[#allocation5 + $0x10c] sm:$0xf] }
  0xb9   :  { %1759 = vmatpush.bf16.msra.mxu1 %v3712_v10  ;;  %v4144_v10 = vor.u32 %v5055_v2, %v4143_v1  ;;  %v3508_v13 = vor.u32 %v4893_v6, %v3505_v7  ;;  %v4969_v1 = vld [vmem:[#allocation5 + $0x3ec] sm:$0xf]  ;;  %v3809_v2 = vld [vmem:[#allocation5 + $0x3f8] sm:$0xf0] }
  0xba   :  { %v5033_v6 = vld [vmem:[#allocation5 + $0x5ec] sm:$0xf]  ;;  %v4065_v7 = vld [vmem:[#allocation5 + $0x5f8] sm:$0xf0] }
  0xbb   :  { %1773 = vmatpush.bf16.msra.mxu2 %v3840_v12  ;;  %1787 = vmatpush.bf16.msra.mxu3 %v3968_v16  ;;  %v3380_v12 = vor.u32 %v4861_v3, %v3377_v5  ;;  %v4857_v16 = vld [vmem:[#allocation5 + $0x6c] sm:$0xf]  ;;  %v3937_v5 = vld [vmem:[#allocation5 + $0x4f8] sm:$0xf0] }
  0xbc   :  { %1746 = vmatpush.bf16.msra.mxu0 %v3568_v24  ;;  %v4128_v24 = vor.u32 %v5051_v15, %v4127_v14  ;;  %v3364_v25 = vor.u32 %v4857_v16, %v3361_v18  ;;  %v5001_v3 = vld [vmem:[#allocation5 + $0x4ec] sm:$0xf]  ;;  %v3812_v14 = vor.u32 %v4969_v1, %v3809_v2  ;;  %v4068_v16 = vor.u32 %v5033_v6, %v4065_v7  ;;  %v3793_v18 = vld [vmem:[#allocation5 + $0x3d8] sm:$0xf0] }
  0xbd   :  { %1760 = vmatpush.bf16.msra.mxu1 %v3696_v28  ;;  %v5047_v28 = vld [vmem:[#allocation5 + $0x654] sm:$0xf0]  ;;  %v3940_v15 = vor.u32 %v5001_v3, %v3937_v5  ;;  %v4129_v1 = vld [vmem:[#allocation5 + $0x678] sm:$0xf0]  ;;  %v5536_v2 = vpop.f32.mrf.mxu1  ;;  %v4949_v6 = vld [vmem:[#allocation5 + $0x34c] sm:$0xf] }
  0xbe   :  { %v4112_v36 = vor.u32 %v5047_v28, %v4111_v27  ;;  %v3924_v28 = vor.u32 %v4997_v19, %v3921_v21  ;;  %v3729_v7 = vld [vmem:[#allocation5 + $0x358] sm:$0xf0]  ;;  %v4945_v19 = vld [vmem:[#allocation5 + $0x32c] sm:$0xf] }
  0xbf   :  { %1774 = vmatpush.bf16.msra.mxu2 %v3824_v29  ;;  %1788 = vmatpush.bf16.msra.mxu3 %v3952_v32  ;;  %v4853_v29 = vld [vmem:[#allocation5 + $0x4c] sm:$0xf] }
  0xc0   :  { %1795 = vmatpush.bf16.msrb.mxu0 %v4192_v33  ;;  %1761 = vmatmul.bf16.vlgmr.msra.gmra.mxu1 %v5505_v23  ;;  %v4885_v32 = vld [vmem:[#allocation5 + $0x14c] sm:$0xf]  ;;  %v3473_v33 = vld [vmem:[#allocation5 + $0x158] sm:$0xf0]  ;;  %v3348_v38 = vor.u32 %v4853_v29, %v3345_v31 }
  0xc1   :  { %1809 = vmatpush.bf16.msrb.mxu1 %v3428_v34  ;;  %1747 = vmatmul.bf16.vlgmr.msra.gmra.mxu0 %v5498_v0  ;;  %v4917_v34 = vld [vmem:[#allocation5 + $0x24c] sm:$0xf]  ;;  %v3476_v39 = vor.u32 %v4885_v32, %v3473_v33  ;;  %v3777_v31 = vld [vmem:[#allocation5 + $0x3b8] sm:$0xf0] }
  0xc2   :  { %1775 = vmatmul.bf16.vlgmr.msra.gmra.mxu2 %v5508_v37  ;;  %1789 = vmatmul.bf16.vlgmr.msra.gmra.mxu3 %v5512_v42  ;;  %v4993_v32 = vld [vmem:[#allocation5 + $0x4ac] sm:$0xf] }
  0xc3   :  { %1823 = vmatpush.bf16.msrb.mxu2 %v3556_v35  ;;  %1837 = vmatpush.bf16.msrb.mxu3 %v3684_v40  ;;  %v3601_v35 = vld [vmem:[#allocation5 + $0x258] sm:$0xf0]  ;;  %v4095_v40 = vld [vmem:[#allocation5 + $0x628] sm:$0xf]  ;;  %v4977_v21 = vld [vmem:[#allocation5 + $0x42c] sm:$0xf] }
  0xc4   :  { %1796 = vmatpush.bf16.msrb.mxu0 %v4176_v48  ;;  %v3604_v45 = vor.u32 %v4917_v34, %v3601_v35  ;;  %v3457_v48 = vld [vmem:[#allocation5 + $0x138] sm:$0xf0]  ;;  %v4096_v51 = vor.u32 %v5043_v43, %v4095_v40  ;;  %v5025_v35 = vld [vmem:[#allocation5 + $0x5ac] sm:$0xf] }
  0xc5   :  { %1810 = vmatpush.bf16.msrb.mxu1 %v3412_v49  ;;  %v4913_v49 = vld [vmem:[#allocation5 + $0x22c] sm:$0xf]  ;;  %v3460_v55 = vor.u32 %v4881_v47, %v3457_v48  ;;  %v3905_v34 = vld [vmem:[#allocation5 + $0x4b8] sm:$0xf0] }
  0xc6   :  { %v3908_v43 = vor.u32 %v4993_v32, %v3905_v34  ;;  %v4989_v47 = vld [vmem:[#allocation5 + $0x48c] sm:$0xf] }
  0xc7   :  { %1824 = vmatpush.bf16.msrb.mxu2 %v3540_v50  ;;  %1838 = vmatpush.bf16.msrb.mxu3 %v3668_v54  ;;  %v3585_v50 = vld [vmem:[#allocation5 + $0x238] sm:$0xf0]  ;;  %v3332_v54 = vor.u32 %v4849_v44, %v3329_v46  ;;  %v4941_v32 = vld [vmem:[#allocation5 + $0x30c] sm:$0xf] }
  0xc8   :  { %1797 = vmatpush.bf16.msrb.mxu0 %v4160_v61  ;;  %v3588_v60 = vor.u32 %v4913_v49, %v3585_v50  ;;  %v3441_v61 = vld [vmem:[#allocation5 + $0x118] sm:$0xf0]  ;;  %v5021_v50 = vld [vmem:[#allocation5 + $0x58c] sm:$0xf] }
  0xc9   :  { %1811 = vmatpush.bf16.msrb.mxu1 %v3396_v62  ;;  %v4909_v62 = vld [vmem:[#allocation5 + $0x20c] sm:$0xf]  ;;  %v3444_v9 = vor.u32 %v4877_v59, %v3441_v61  ;;  %v3761_v46 = vld [vmem:[#allocation5 + $0x398] sm:$0xf0] }
  0xca   :  { %v3889_v49 = vld [vmem:[#allocation5 + $0x498] sm:$0xf0] }
  0xcb   :  { %1825 = vmatpush.bf16.msrb.mxu2 %v3524_v63  ;;  %1839 = vmatpush.bf16.msrb.mxu3 %v3652_v4  ;;  %v3569_v63 = vld [vmem:[#allocation5 + $0x218] sm:$0xf0]  ;;  %v4080_v4 = vor.u32 %v5039_v53, %v4079_v52  ;;  %v3892_v53 = vor.u32 %v4989_v47, %v3889_v49  ;;  %v4311_v49 = vld [vmem:[#allocation8 + $0xe0] sm:$0xf] }
  0xcc   :  { %1798 = vmatpush.bf16.msrb.mxu0 %v4144_v10  ;;  %v5065_v10 = vld [vmem:[#allocation5 + $0x6ec] sm:$0xf]  ;;  %v4145_v52 = vld [vmem:[#allocation5 + $0x698] sm:$0xf0] }
  0xcd   :  { %1812 = vmatpush.bf16.msrb.mxu1 %v3380_v12  ;;  %v4193_v12 = vld [vmem:[#allocation5 + $0x6f8] sm:$0xf0] }
  0xce   :  { %v4196_v20 = vor.u32 %v5065_v10, %v4193_v12  ;;  %v3873_v59 = vld [vmem:[#allocation5 + $0x478] sm:$0xf0]  ;;  %v5013_v12 = vld [vmem:[#allocation5 + $0x54c] sm:$0xf] }
  0xcf   :  { %1826 = vmatpush.bf16.msrb.mxu2 %v3508_v13  ;;  %1840 = vmatpush.bf16.msrb.mxu3 %v3636_v17  ;;  %v3572_v13 = vor.u32 %v4909_v62, %v3569_v63  ;;  %v4965_v17 = vld [vmem:[#allocation5 + $0x3cc] sm:$0xf]  ;;  %v4001_v61 = vld [vmem:[#allocation5 + $0x578] sm:$0xf0]  ;;  %v5534_v62 = vpop.f32.mrf.mxu0 }
  0xd0   :  { %1799 = vmatpush.bf16.msrb.mxu0 %v4128_v24  ;;  %v4049_v24 = vld [vmem:[#allocation5 + $0x5d8] sm:$0xf0]  ;;  %v3796_v27 = vor.u32 %v4965_v17, %v3793_v18  ;;  %v5049_v63 = vld [vmem:[#allocation5 + $0x66c] sm:$0xf]  ;;  %v5542_v47 = vpop.f32.mrf.mxu3 }
  0xd1   :  { %1813 = vmatpush.bf16.msrb.mxu1 %v3364_v25  ;;  %v5061_v25 = vld [vmem:[#allocation5 + $0x6cc] sm:$0xf]  ;;  %v4052_v29 = vor.u32 %v5029_v22, %v4049_v24  ;;  %v3857_v10 = vld [vmem:[#allocation5 + $0x458] sm:$0xf0]  ;;  %v5538_v22 = vpop.f32.mrf.mxu2 }
  0xd3   :  { %1827 = vmatpush.bf16.msrb.mxu2 %v3492_v26  ;;  %1841 = vmatpush.bf16.msrb.mxu3 %v3620_v30  ;;  %v4177_v26 = vld [vmem:[#allocation5 + $0x6d8] sm:$0xf0]  ;;  %v4961_v30 = vld [vmem:[#allocation5 + $0x3ac] sm:$0xf] }
  0xd4   :  { %1800 = vmatpush.bf16.msrb.mxu0 %v4112_v36  ;;  %v4180_v33 = vor.u32 %v5061_v25, %v4177_v26  ;;  %v4033_v36 = vld [vmem:[#allocation5 + $0x5b8] sm:$0xf0]  ;;  %v3780_v40 = vor.u32 %v4961_v30, %v3777_v31  ;;  %v5009_v26 = vld [vmem:[#allocation5 + $0x52c] sm:$0xf]  ;;  %v5540_v30 = vld [vmem:[#allocation7] sm:$0xf] }
  0xd5   :  { %1814 = vmatpush.bf16.msrb.mxu1 %v3348_v38  ;;  %v5057_v38 = vld [vmem:[#allocation5 + $0x6ac] sm:$0xf]  ;;  %v4036_v44 = vor.u32 %v5025_v35, %v4033_v36  ;;  %v3841_v25 = vld [vmem:[#allocation5 + $0x438] sm:$0xf0] }
  0xd6   :  { %v3844_v34 = vor.u32 %v4977_v21, %v3841_v25  ;;  %v3697_v36 = vld [vmem:[#allocation5 + $0x318] sm:$0xf0]  ;;  %v5082_v25 = vld [vmem:[#allocation8 + $0x6c] sm:$0xf0] }
  0xd7   :  { %1828 = vmatpush.bf16.msrb.mxu2 %v3476_v39  ;;  %1842 = vmatpush.bf16.msrb.mxu3 %v3604_v45  ;;  %v4161_v39 = vld [vmem:[#allocation5 + $0x6b8] sm:$0xf0]  ;;  %v4957_v45 = vld [vmem:[#allocation5 + $0x38c] sm:$0xf] }
  0xd8   :  { %1801 = vmatpush.bf16.msrb.mxu0 %v4096_v51  ;;  %v4164_v48 = vor.u32 %v5057_v38, %v4161_v39  ;;  %v5053_v51 = vld [vmem:[#allocation5 + $0x68c] sm:$0xf]  ;;  %v3825_v39 = vld [vmem:[#allocation5 + $0x418] sm:$0xf0] }
  0xd9   :  { %1815 = vmatpush.bf16.msrb.mxu1 %v3332_v54  ;;  %v4953_v54 = vld [vmem:[#allocation5 + $0x36c] sm:$0xf]  ;;  %v4148_v58 = vor.u32 %v5053_v51, %v4145_v52  ;;  %v4439_v51 = vld [vmem:[#allocation8 + $0x1e0] sm:$0xf]  ;;  %v5130_v52 = vld [vmem:[#allocation8 + $0x1ec] sm:$0xf0] }
  0xda   :  { %v4973_v38 = vld [vmem:[#allocation5 + $0x40c] sm:$0xf] }
  0xdb   :  { %1829 = vmatpush.bf16.msrb.mxu2 %v3460_v55  ;;  %1843 = vmatpush.bf16.msrb.mxu3 %v3588_v60  ;;  %v3745_v55 = vld [vmem:[#allocation5 + $0x378] sm:$0xf0]  ;;  %v5017_v60 = vld [vmem:[#allocation5 + $0x56c] sm:$0xf] }
  0xdc   :  { %1802 = vmatpush.bf16.msrb.mxu0 %v4080_v4  ;;  %v3748_v3 = vor.u32 %v4953_v54, %v3745_v55  ;;  %v3876_v4 = vor.u32 %v4985_v56, %v3873_v59  ;;  %v4004_v5 = vor.u32 %v5017_v60, %v4001_v61  ;;  %v4440_v56 = vor.u32 %v5130_v52, %v4439_v51  ;;  %v5094_v59 = vld [vmem:[#allocation8 + $0xcc] sm:$0xf0]  ;;  %v1554_v60 = vpop.f32.mrf.mxu2  ;;  %v4423_v61 = vld [vmem:[#allocation8 + $0x1c0] sm:$0xf] }
  0xdd   :  { %1816 = vmatpush.bf16.msrb.mxu1 %v3316_v8  ;;  %v4981_v8 = vld [vmem:[#allocation5 + $0x44c] sm:$0xf]  ;;  %v352_v52 = vperm.slane %v5540_v30, 1 }
  0xde   :  { %v3860_v17 = vor.u32 %v4981_v8, %v3857_v10  ;;  %v5090_v8 = vld [vmem:[#allocation8 + $0xac] sm:$0xf0]  ;;  %v4407_v10 = vld [vmem:[#allocation8 + $0x1a0] sm:$0xf] }
  0xdf   :  { %1830 = vmatpush.bf16.msrb.mxu2 %v3444_v9  ;;  %1844 = vmatpush.bf16.msrb.mxu3 %v3572_v13  ;;  %v4132_v9 = vor.u32 %v5049_v63, %v4129_v1  ;;  %v3985_v13 = vld [vmem:[#allocation5 + $0x558] sm:$0xf0]  ;;  %v5126_v63 = vld [vmem:[#allocation8 + $0x1cc] sm:$0xf0] }
  0xe0   :  { %1851 = vmatpush.bf16.msra.mxu0 %v3812_v14  ;;  %1817 = vmatmul.bf16.vlgmr.msrb.gmra.mxu1 %v5496_v57  ;;  %v5045_v14 = vld [vmem:[#allocation5 + $0x64c] sm:$0xf]  ;;  %v3988_v18 = vor.u32 %v5013_v12, %v3985_v13 }
  0xe1   :  { %1865 = vmatpush.bf16.msra.mxu1 %v3940_v15  ;;  %1803 = vmatmul.bf16.vlgmr.msrb.gmra.mxu0 %v5510_v41  ;;  %v4113_v15 = vld [vmem:[#allocation5 + $0x658] sm:$0xf0] }
  0xe2   :  { %1831 = vmatmul.bf16.vlgmr.msrb.gmra.mxu2 %v5502_v11  ;;  %1845 = vmatmul.bf16.vlgmr.msrb.gmra.mxu3 %v5498_v0  ;;  %v4017_v11 = vld [vmem:[#allocation5 + $0x598] sm:$0xf0]  ;;  %v3764_v0 = vor.u32 %v4957_v45, %v3761_v46  ;;  %v4116_v24 = vor.u32 %v5045_v14, %v4113_v15  ;;  %v5037_v46 = vld [vmem:[#allocation5 + $0x60c] sm:$0xf]  ;;  %v1568_v14 = vpop.f32.mrf.mxu3 }
  0xe3   :  { %1879 = vmatpush.bf16.msra.mxu2 %v4068_v16  ;;  %1893 = vmatpush.bf16.msra.mxu3 %v4196_v20  ;;  %v4020_v57 = vor.u32 %v5021_v50, %v4017_v11  ;;  %v3732_v16 = vor.u32 %v4949_v6, %v3729_v7  ;;  %v3713_v20 = vld [vmem:[#allocation5 + $0x338] sm:$0xf0]  ;;  %v5098_v50 = vld [vmem:[#allocation8 + $0xec] sm:$0xf0]  ;;  %v3700_v11 = vor.u32 %v4941_v32, %v3697_v36  ;;  %v4279_v7 = vld [vmem:[#allocation8 + $0xa0] sm:$0xf] }
  0xe4   :  { %1852 = vmatpush.bf16.msra.mxu0 %v3796_v27  ;;  %v3969_v27 = vld [vmem:[#allocation5 + $0x538] sm:$0xf0]  ;;  %v3716_v31 = vor.u32 %v4945_v19, %v3713_v20  ;;  %v4312_v55 = vor.u32 %v5098_v50, %v4311_v49  ;;  %v4424_v6 = vor.u32 %v5126_v63, %v4423_v61  ;;  %v4280_v15 = vor.u32 %v5090_v8, %v4279_v7  ;;  %v5118_v19 = vld [vmem:[#allocation8 + $0x18c] sm:$0xf0]  ;;  %v4359_v36 = vld [vmem:[#allocation8 + $0x140] sm:$0xf] }
  0xe5   :  { %1866 = vmatpush.bf16.msra.mxu1 %v3924_v28  ;;  %v5041_v28 = vld [vmem:[#allocation5 + $0x62c] sm:$0xf]  ;;  %v3972_v35 = vor.u32 %v5009_v26, %v3969_v27  ;;  %v3953_v45 = vld [vmem:[#allocation5 + $0x518] sm:$0xf0]  ;;  %v4375_v26 = vld [vmem:[#allocation8 + $0x160] sm:$0xf] }
  0xe6   :  { %v5106_v49 = vld [vmem:[#allocation8 + $0x12c] sm:$0xf0]  ;;  %v4441_v7 = vld [vmem:[#allocation8 + $0x1f0] sm:$0xf0] }
  0xe7   :  { %1880 = vmatpush.bf16.msra.mxu2 %v4052_v29  ;;  %1894 = vmatpush.bf16.msra.mxu3 %v4180_v33  ;;  %v4097_v29 = vld [vmem:[#allocation5 + $0x638] sm:$0xf0]  ;;  %v1526_v33 = vpop.f32.mrf.mxu0  ;;  %v5162_v61 = vld [vmem:[#allocation8 + $0x2ec] sm:$0xf0] }
  0xe8   :  { %1853 = vmatpush.bf16.msra.mxu0 %v3780_v40  ;;  %v1540_v40 = vpop.f32.mrf.mxu1  ;;  %v5102_v63 = vld [vmem:[#allocation8 + $0x10c] sm:$0xf0] }
  0xe9   :  { %1867 = vmatpush.bf16.msra.mxu1 %v3908_v43  ;;  %v4100_v43 = vor.u32 %v5041_v28, %v4097_v29 }
  0xeb   :  { %1881 = vmatpush.bf16.msra.mxu2 %v4036_v44  ;;  %1895 = vmatpush.bf16.msra.mxu3 %v4164_v48  ;;  %v5005_v44 = vld [vmem:[#allocation5 + $0x50c] sm:$0xf]  ;;  %v4081_v48 = vld [vmem:[#allocation5 + $0x618] sm:$0xf0] }
  0xec   :  { %1854 = vmatpush.bf16.msra.mxu0 %v3764_v0  ;;  %v351_v0 = vperm.slane %v5540_v30, 0  ;;  %v4084_v54 = vor.u32 %v5037_v46, %v4081_v48  ;;  %v5074_v46 = vld [vmem:[#allocation8 + $0x2c] sm:$0xf0]  ;;  %v4343_v48 = vld [vmem:[#allocation8 + $0x120] sm:$0xf] }
  0xed   :  { %1868 = vmatpush.bf16.msra.mxu1 %v3892_v53  ;;  %v3828_v53 = vor.u32 %v4973_v38, %v3825_v39  ;;  %v5110_v38 = vld [vmem:[#allocation8 + $0x14c] sm:$0xf0] }
  0xee   :  { %v1525_v1 = vadd.f32 %v5534_v62, %v351_v0  ;;  %v5122_v62 = vld [vmem:[#allocation8 + $0x1ac] sm:$0xf0] }
  0xef   :  { %1882 = vmatpush.bf16.msra.mxu2 %v4020_v57  ;;  %1896 = vmatpush.bf16.msra.mxu3 %v4148_v58  ;;  %v3956_v57 = vor.u32 %v5005_v44, %v3953_v45  ;;  %v4295_v58 = vld [vmem:[#allocation8 + $0xc0] sm:$0xf]  ;;  %v4360_v44 = vor.u32 %v5110_v38, %v4359_v36 }
  0xf0   :  { %1855 = vmatpush.bf16.msra.mxu0 %v3748_v3  ;;  %v1527_v3 = vadd.f32 %v1526_v33, %v351_v0  ;;  %v1539_v12 = vadd.f32 %v5536_v2, %v1525_v1  ;;  %v4215_v45 = vld [vmem:[#allocation8 + $0x20] sm:$0xf]  ;;  %v5096_v1 = vld [vmem:[#allocation8 + $0xe4] sm:$0xf] }
  0xf1   :  { %1869 = vmatpush.bf16.msra.mxu1 %v3876_v4  ;;  %v4296_v4 = vor.u32 %v5094_v59, %v4295_v58  ;;  %v4344_v58 = vor.u32 %v5106_v49, %v4343_v48  ;;  %v4327_v59 = vld [vmem:[#allocation8 + $0x100] sm:$0xf]  ;;  %v4393_v48 = vld [vmem:[#allocation8 + $0x190] sm:$0xf0] }
  0xf2   :  { %v1541_v13 = vadd.f32 %v1540_v40, %v1527_v3  ;;  %v4313_v3 = vld [vmem:[#allocation8 + $0xf0] sm:$0xf0]  ;;  %v4519_v38 = vld [vmem:[#allocation8 + $0x280] sm:$0xf] }
  0xf3   :  { %1883 = vmatpush.bf16.msra.mxu2 %v4004_v5  ;;  %1897 = vmatpush.bf16.msra.mxu3 %v4132_v9  ;;  %v1580_v5 = vpop.f32.mrf.mxu0  ;;  %v1594_v9 = vpop.f32.mrf.mxu1 }
  0xf4   :  { %1856 = vmatpush.bf16.msra.mxu0 %v3732_v16  ;;  %v4263_v16 = vld [vmem:[#allocation8 + $0x80] sm:$0xf]  ;;  %v1555_v20 = vadd.f32 %v1554_v60, %v1541_v13 }
  0xf5   :  { %1870 = vmatpush.bf16.msra.mxu1 %v3860_v17  ;;  %v5086_v17 = vld [vmem:[#allocation8 + $0x8c] sm:$0xf0]  ;;  %v4567_v60 = vld [vmem:[#allocation8 + $0x2e0] sm:$0xf] }
  0xf6   :  { %v4264_v21 = vor.u32 %v5086_v17, %v4263_v16  ;;  %v1569_v28 = vadd.f32 %v1568_v14, %v1555_v20  ;;  %v4551_v13 = vld [vmem:[#allocation8 + $0x2c0] sm:$0xf]  ;;  %v5158_v16 = vld [vmem:[#allocation8 + $0x2cc] sm:$0xf0] }
  0xf7   :  { %1884 = vmatpush.bf16.msra.mxu2 %v3988_v18  ;;  %1898 = vmatpush.bf16.msra.mxu3 %v4116_v24  ;;  %v4391_v18 = vld [vmem:[#allocation8 + $0x180] sm:$0xf]  ;;  %v4552_v20 = vor.u32 %v5158_v16, %v4551_v13 }
  0xf8   :  { %1857 = vmatpush.bf16.msra.mxu0 %v3716_v31  ;;  %v4392_v2 = vor.u32 %v5118_v19, %v4391_v18  ;;  %v4247_v24 = vld [vmem:[#allocation8 + $0x60] sm:$0xf]  ;;  %v1622_v31 = vpop.f32.mrf.mxu3  ;;  %v5124_v19 = vld [vmem:[#allocation8 + $0x1c4] sm:$0xf] }
  0xf9   :  { %1871 = vmatpush.bf16.msra.mxu1 %v3844_v34  ;;  %v4248_v33 = vor.u32 %v5082_v25, %v4247_v24  ;;  %v4231_v34 = vld [vmem:[#allocation8 + $0x40] sm:$0xf]  ;;  %v1623_v8 = vadd.f32 %v1622_v31, %v352_v52  ;;  %v4281_v31 = vld [vmem:[#allocation8 + $0xb0] sm:$0xf0] }
  0xfa   :  { %v4535_v25 = vld [vmem:[#allocation8 + $0x2a0] sm:$0xf] }
  0xfb   :  { %1885 = vmatpush.bf16.msra.mxu2 %v3972_v35  ;;  %1899 = vmatpush.bf16.msra.mxu3 %v4100_v43  ;;  %v1582_v29 = vpop.f32.mrf.mxu0  ;;  %v1596_v32 = vpop.f32.mrf.mxu1  ;;  %v5078_v35 = vld [vmem:[#allocation8 + $0x4c] sm:$0xf0]  ;;  %v4471_v16 = vld [vmem:[#allocation8 + $0x220] sm:$0xf] }
  0xfc   :  { %1858 = vmatpush.bf16.msra.mxu0 %v3700_v11  ;;  %v1583_v40 = vadd.f32 %v1582_v29, %v1569_v28  ;;  %v4232_v43 = vor.u32 %v5078_v35, %v4231_v34  ;;  %v5088_v29 = vld [vmem:[#allocation8 + $0xa4] sm:$0xf]  ;;  %v4409_v34 = vld [vmem:[#allocation8 + $0x1b0] sm:$0xf0] }
  0xfd   :  { %1872 = vmatpush.bf16.msra.mxu1 %v3828_v53  ;;  %v4216_v53 = vor.u32 %v5074_v46, %v4215_v45  ;;  %v4284_v36 = vor.u32 %v5088_v29, %v4281_v31  ;;  %v4265_v45 = vld [vmem:[#allocation8 + $0x90] sm:$0xf0]  ;;  %v5100_v29 = vld [vmem:[#allocation8 + $0x104] sm:$0xf]  ;;  %v4455_v31 = vld [vmem:[#allocation8 + $0x200] sm:$0xf] }
  0xfe   :  { %v1597_v11 = vadd.f32 %v1596_v32, %v1583_v40 }
  0xff   :  { %1886 = vmatpush.bf16.msra.mxu2 %v3956_v57  ;;  %1900 = vmatpush.bf16.msra.mxu3 %v4084_v54  ;;  %v4199_v57 = vld [vmem:[#allocation8] sm:$0xf]  ;;  %v5070_v54 = vld [vmem:[#allocation8 + $0xc] sm:$0xf0] }
 0x100   :  { %2697 = vmatpush.bf16.msrb.mxu0 %v4312_v55  ;;  %1873 = vmatmul.bf16.vlgmr.msra.gmra.mxu1 %v5508_v37  ;;  %v1553_v37 = vadd.f32 %v5538_v22, %v1539_v12  ;;  %v4316_v12 = vor.u32 %v5096_v1, %v4313_v3 }
 0x101   :  { %2711 = vmatpush.bf16.msrb.mxu1 %v4440_v56  ;;  %1859 = vmatmul.bf16.vlgmr.msra.gmra.mxu0 %v5505_v23  ;;  %v4408_v23 = vor.u32 %v5122_v62, %v4407_v10  ;;  %v1624_v56 = vpop.f32.mrf.mxu3  ;;  %v4328_v62 = vor.u32 %v5102_v63, %v4327_v59  ;;  %v5112_v59 = vld [vmem:[#allocation8 + $0x164] sm:$0xf] }
 0x102   :  { %1887 = vmatmul.bf16.vlgmr.msra.gmra.mxu2 %v5512_v42  ;;  %1901 = vmatmul.bf16.vlgmr.msra.gmra.mxu3 %v5510_v41  ;;  %v1608_v42 = vpop.f32.mrf.mxu2  ;;  %v5114_v41 = vld [vmem:[#allocation8 + $0x16c] sm:$0xf0]  ;;  %v1567_v27 = vadd.f32 %v5542_v47, %v1553_v37  ;;  %v4425_v37 = vld [vmem:[#allocation8 + $0x1d0] sm:$0xf0] }
 0x103   :  { %v4376_v22 = vor.u32 %v5114_v41, %v4375_v26  ;;  %v1636_v51 = vpop.f32.mrf.mxu0  ;;  %v1650_v0 = vpop.f32.mrf.mxu1  ;;  %v5154_v26 = vld [vmem:[#allocation8 + $0x2ac] sm:$0xf0]  ;;  %v1625_v41 = vadd.f32 %v1624_v56, %v352_v52  ;;  %v4428_v28 = vor.u32 %v5124_v19, %v4425_v37  ;;  %v4503_v52 = vld [vmem:[#allocation8 + $0x260] sm:$0xf]  ;;  %v4249_v56 = vld [vmem:[#allocation8 + $0x70] sm:$0xf0] }
 0x104   :  { %2698 = vmatpush.bf16.msrb.mxu0 %v4296_v4  ;;  %v1581_v39 = vadd.f32 %v1580_v5, %v1567_v27  ;;  %v4568_v4 = vor.u32 %v5162_v61, %v4567_v60  ;;  %v4536_v32 = vor.u32 %v5154_v26, %v4535_v25  ;;  %v4377_v60 = vld [vmem:[#allocation8 + $0x170] sm:$0xf0] }
 0x105   :  { %2712 = vmatpush.bf16.msrb.mxu1 %v4424_v6  ;;  %v5128_v6 = vld [vmem:[#allocation8 + $0x1e4] sm:$0xf]  ;;  %v4345_v25 = vld [vmem:[#allocation8 + $0x130] sm:$0xf0] }
 0x106   :  { %v1595_v50 = vadd.f32 %v1594_v9, %v1581_v39  ;;  %v4200_v9 = vor.u32 %v5070_v54, %v4199_v57  ;;  %2725 = vmatpush.bf16.msrb.mxu2 %v4568_v4  ;;  %v4444_v14 = vor.u32 %v5128_v6, %v4441_v7  ;;  %v5150_v39 = vld [vmem:[#allocation8 + $0x28c] sm:$0xf0]  ;;  %v5076_v4 = vld [vmem:[#allocation8 + $0x44] sm:$0xf] }
 0x107   :  { %v4520_v46 = vor.u32 %v5150_v39, %v4519_v38  ;;  %v5142_v6 = vld [vmem:[#allocation8 + $0x24c] sm:$0xf0]  ;;  %v4569_v38 = vld [vmem:[#allocation8 + $0x2f0] sm:$0xf0] }
 0x108   :  { %2699 = vmatpush.bf16.msrb.mxu0 %v4280_v15  ;;  %v1609_v5 = vadd.f32 %v1608_v42, %v1595_v50  ;;  %v5092_v15 = vld [vmem:[#allocation8 + $0xc4] sm:$0xf]  ;;  %v1637_v42 = vadd.f32 %v1636_v51, %v1623_v8  ;;  %v4380_v8 = vor.u32 %v5112_v59, %v4377_v60  ;;  %v4329_v39 = vld [vmem:[#allocation8 + $0x110] sm:$0xf0]  ;;  %v4695_v59 = vld [vmem:[#allocation8 + $0x3e0] sm:$0xf] }
 0x109   :  { %2713 = vmatpush.bf16.msrb.mxu1 %v4408_v23  ;;  %v4297_v23 = vld [vmem:[#allocation8 + $0xd0] sm:$0xf0]  ;;  %v5194_v60 = vld [vmem:[#allocation8 + $0x3ec] sm:$0xf0] }
 0x10a   :  { %v1610_v47 = vpop.f32.mrf.mxu2  ;;  %v1907_v17 = vmax.f32 %v1609_v5, 0.0  ;;  %v4300_v24 = vor.u32 %v5092_v15, %v4297_v23  ;;  %2726 = vmatpush.bf16.msrb.mxu2 %v4552_v20  ;;  %v1651_v35 = vadd.f32 %v1650_v0, %v1637_v42  ;;  %v5146_v0 = vld [vmem:[#allocation8 + $0x26c] sm:$0xf0]  ;;  %v4487_v5 = vld [vmem:[#allocation8 + $0x240] sm:$0xf] }
 0x10b   :  { %v1611_v55 = vadd.f32 %v1610_v47, %v1597_v11  ;;  %v1652_v27 = vpop.f32.mrf.mxu1  ;;  %v5116_v47 = vld [vmem:[#allocation8 + $0x184] sm:$0xf]  ;;  %v4217_v42 = vld [vmem:[#allocation8 + $0x30] sm:$0xf0] }
 0x10c   :  { %2700 = vmatpush.bf16.msrb.mxu0 %v4264_v21  ;;  %v4396_v57 = vor.u32 %v5116_v47, %v4393_v48  ;;  %v5072_v20 = vld [vmem:[#allocation8 + $0x24] sm:$0xf]  ;;  %v5131_v47 = vld [vmem:[#allocation8 + $0x1f4] sm:$0xf0] }
 0x10d   :  { %2714 = vmatpush.bf16.msrb.mxu1 %v4392_v2  ;;  %v1911_v10 = vmax.f32 %v1611_v55, 0.0  ;;  %v1638_v2 = vpop.f32.mrf.mxu0  ;;  %v5080_v55 = vld [vmem:[#allocation8 + $0x64] sm:$0xf] }
 0x10e   :  { %v1639_v40 = vadd.f32 %v1638_v2, %v1625_v41  ;;  %2727 = vmatpush.bf16.msrb.mxu2 %v4536_v32  ;;  %v4252_v3 = vor.u32 %v5080_v55, %v4249_v56  ;;  %v5068_v41 = vld [vmem:[#allocation8 + $0x4] sm:$0xf]  ;;  %v5134_v32 = vld [vmem:[#allocation8 + $0x20c] sm:$0xf0] }
 0x10f   :  { %v5554_v21 = vpack.c.bf16 %v1911_v10, %v1907_v17  ;;  %v5108_v10 = vld [vmem:[#allocation8 + $0x144] sm:$0xf]  ;;  %v5138_v17 = vld [vmem:[#allocation8 + $0x22c] sm:$0xf0] }
 0x110   :  { %2701 = vmatpush.bf16.msrb.mxu0 %v4248_v33  ;;  %v1678_v33 = vpop.f32.mrf.mxu3  ;;  %v4472_v2 = vor.u32 %v5138_v17, %v4471_v16  ;;  %v4399_v16 = vld [vmem:[#allocation8 + $0x188] sm:$0xf]  ;;  %v5119_v17 = vld [vmem:[#allocation8 + $0x194] sm:$0xf0] }
 0x111   :  { %2715 = vmatpush.bf16.msrb.mxu1 %v4376_v22  ;;  %v5120_v22 = vld [vmem:[#allocation8 + $0x1a4] sm:$0xf] }
 0x112   :  { %v1664_v18 = vpop.f32.mrf.mxu2  ;;  %2728 = vmatpush.bf16.msrb.mxu2 %v4520_v46  ;;  %v4447_v46 = vld [vmem:[#allocation8 + $0x1e8] sm:$0xf] }
 0x113   :  { %v1665_v49 = vadd.f32 %v1664_v18, %v1651_v35  ;;  %v4456_v35 = vor.u32 %v5134_v32, %v4455_v31 }
 0x114   :  { %2702 = vmatpush.bf16.msrb.mxu0 %v4232_v43  ;;  %v4412_v43 = vor.u32 %v5120_v22, %v4409_v34 }
 0x115   :  { %2716 = vmatpush.bf16.msrb.mxu1 %v4360_v44  ;;  %v5084_v44 = vld [vmem:[#allocation8 + $0x84] sm:$0xf]  ;;  %v1679_v61 = vadd.f32 %v1678_v33, %v1665_v49  ;;  %v4332_v49 = vor.u32 %v5100_v29, %v4329_v39  ;;  %v5115_v29 = vld [vmem:[#allocation8 + $0x174] sm:$0xf0] }
 0x116   :  { %v4268_v51 = vor.u32 %v5084_v44, %v4265_v45  ;;  %v5079_v39 = vld [vmem:[#allocation8 + $0x54] sm:$0xf0] }
 0x118   :  { %2703 = vmatpush.bf16.msrb.mxu0 %v4216_v53  ;;  %v1653_v53 = vadd.f32 %v1652_v27, %v1639_v40  ;;  %v1680_v1 = vpop.f32.mrf.mxu3  ;;  %v4201_v27 = vld [vmem:[#allocation8 + $0x10] sm:$0xf0]  ;;  %v4319_v40 = vld [vmem:[#allocation8 + $0xe8] sm:$0xf] }
 0x119   :  { %2717 = vmatpush.bf16.msrb.mxu1 %v4344_v58  ;;  %v4504_v58 = vor.u32 %v5146_v0, %v4503_v52  ;;  %v4204_v48 = vor.u32 %v5068_v41, %v4201_v27  ;;  %v4303_v52 = vld [vmem:[#allocation8 + $0xc8] sm:$0xf]  ;;  %v5095_v0 = vld [vmem:[#allocation8 + $0xd4] sm:$0xf0]  ;;  %v5144_v41 = vld [vmem:[#allocation8 + $0x264] sm:$0xf] }
 0x11a   :  { %v1666_v50 = vpop.f32.mrf.mxu2  ;;  %v4304_v56 = vor.u32 %v5095_v0, %v4303_v52  ;;  %v4505_v27 = vld [vmem:[#allocation8 + $0x270] sm:$0xf0]  ;;  %v5075_v52 = vld [vmem:[#allocation8 + $0x34] sm:$0xf0] }
 0x11b   :  { %v1667_v63 = vadd.f32 %v1666_v50, %v1653_v53  ;;  %2729 = vmatpush.bf16.msrb.mxu2 %v4504_v58  ;;  %v4553_v53 = vld [vmem:[#allocation8 + $0x2d0] sm:$0xf0]  ;;  %v4287_v58 = vld [vmem:[#allocation8 + $0xa8] sm:$0xf]  ;;  %v4508_v31 = vor.u32 %v5144_v41, %v4505_v27  ;;  %v5125_v41 = vld [vmem:[#allocation8 + $0x1cc] sm:$0xf] }
 0x11c   :  { %2704 = vmatpush.bf16.msrb.mxu0 %v4200_v9  ;;  %v4233_v9 = vld [vmem:[#allocation8 + $0x50] sm:$0xf0]  ;;  %v4433_v27 = vld [vmem:[#allocation8 + $0x1d8] sm:$0xf0] }
 0x11d   :  { %2718 = vmatpush.bf16.msrb.mxu1 %v4328_v62  ;;  %v1706_v54 = vpop.f32.mrf.mxu1  ;;  %v4361_v62 = vld [vmem:[#allocation8 + $0x150] sm:$0xf0]  ;;  %v1681_v13 = vadd.f32 %v1680_v1, %v1667_v63  ;;  %v4236_v15 = vor.u32 %v5076_v4, %v4233_v9  ;;  %v5091_v63 = vld [vmem:[#allocation8 + $0xb4] sm:$0xf0]  ;;  %v4696_v1 = vor.u32 %v5194_v60, %v4695_v59  ;;  %v4679_v9 = vld [vmem:[#allocation8 + $0x3c0] sm:$0xf] }
 0x11e   :  { %v1692_v11 = vpop.f32.mrf.mxu0  ;;  %v4364_v23 = vor.u32 %v5108_v10, %v4361_v62  ;;  %v4537_v4 = vld [vmem:[#allocation8 + $0x2b0] sm:$0xf0]  ;;  %v5190_v10 = vld [vmem:[#allocation8 + $0x3cc] sm:$0xf0]  ;;  %v5148_v62 = vld [vmem:[#allocation8 + $0x284] sm:$0xf] }
 0x11f   :  { %2705 = vmatmul.bf16.vlgmr.msrb.gmra.mxu0 %v5554_v21  ;;  %v1693_v7 = vadd.f32 %v1692_v11, %v1679_v61  ;;  %v5156_v11 = vld [vmem:[#allocation8 + $0x2c4] sm:$0xf]  ;;  %2739 = vmatpush.bf16.msrb.mxu3 %v4696_v1  ;;  %v4207_v60 = vld [vmem:[#allocation8 + $0x8] sm:$0xf] }
 0x120   :  { %2753 = vmatpush.bf16.msra.mxu0 %v4316_v12  ;;  %v4488_v12 = vor.u32 %v5142_v6, %v4487_v5  ;;  %v4556_v55 = vor.u32 %v5156_v11, %v4553_v53  ;;  %v4415_v5 = vld [vmem:[#allocation8 + $0x1a8] sm:$0xf]  ;;  %v5123_v6 = vld [vmem:[#allocation8 + $0x1b4] sm:$0xf0]  ;;  %v5178_v11 = vld [vmem:[#allocation8 + $0x36c] sm:$0xf0] }
 0x121   :  { %2767 = vmatpush.bf16.msra.mxu1 %v4444_v14  ;;  %v1707_v18 = vadd.f32 %v1706_v54, %v1693_v7  ;;  %v5127_v54 = vld [vmem:[#allocation8 + $0x1d4] sm:$0xf0]  ;;  %v5136_v53 = vld [vmem:[#allocation8 + $0x224] sm:$0xf]  ;;  %v4335_v1 = vld [vmem:[#allocation8 + $0x108] sm:$0xf] }
 0x122   :  { %2730 = vmatpush.bf16.msrb.mxu2 %v4488_v12  ;;  %v4416_v12 = vor.u32 %v5123_v6, %v4415_v5  ;;  %v5174_v6 = vld [vmem:[#allocation8 + $0x34c] sm:$0xf0] }
 0x123   :  { %v1908_v33 = vmax.f32 %v1707_v18, 0.0 }
 0x124   :  { %2754 = vmatpush.bf16.msra.mxu0 %v4300_v24  ;;  %v5104_v24 = vld [vmem:[#allocation8 + $0x124] sm:$0xf] }
 0x125   :  { %2768 = vmatpush.bf16.msra.mxu1 %v4428_v28  ;;  %v1708_v37 = vpop.f32.mrf.mxu1  ;;  %v4220_v28 = vor.u32 %v5072_v20, %v4217_v42  ;;  %v4348_v34 = vor.u32 %v5104_v24, %v4345_v25  ;;  %v4663_v20 = vld [vmem:[#allocation8 + $0x3a0] sm:$0xf]  ;;  %v5186_v42 = vld [vmem:[#allocation8 + $0x3ac] sm:$0xf0]  ;;  %v4400_v24 = vor.u32 %v5119_v17, %v4399_v16  ;;  %v5083_v25 = vld [vmem:[#allocation8 + $0x74] sm:$0xf0] }
 0x126   :  { %v1694_v14 = vpop.f32.mrf.mxu0  ;;  %2731 = vmatpush.bf16.msrb.mxu2 %v4472_v2  ;;  %v5561_v2 = vpop.f32.mrf.mxu2  ;;  %v4599_v17 = vld [vmem:[#allocation8 + $0x320] sm:$0xf] }
 0x127   :  { %v1695_v19 = vadd.f32 %v1694_v14, %v1681_v13  ;;  %v4271_v13 = vld [vmem:[#allocation8 + $0x88] sm:$0xf]  ;;  %v5087_v14 = vld [vmem:[#allocation8 + $0x94] sm:$0xf0] }
 0x128   :  { %2755 = vmatpush.bf16.msra.mxu0 %v4284_v36  ;;  %v5160_v36 = vld [vmem:[#allocation8 + $0x2e4] sm:$0xf] }
 0x129   :  { %2769 = vmatpush.bf16.msra.mxu1 %v4412_v43  ;;  %v1709_v26 = vadd.f32 %v1708_v37, %v1695_v19  ;;  %v5099_v43 = vld [vmem:[#allocation8 + $0xf4] sm:$0xf0]  ;;  %v4572_v44 = vor.u32 %v5160_v36, %v4569_v38  ;;  %v4272_v19 = vor.u32 %v5087_v14, %v4271_v13  ;;  %v4255_v37 = vld [vmem:[#allocation8 + $0x68] sm:$0xf]  ;;  %v5129_v14 = vld [vmem:[#allocation8 + $0x1ec] sm:$0xf] }
 0x12a   :  { %v4320_v50 = vor.u32 %v5099_v43, %v4319_v40  ;;  %2732 = vmatpush.bf16.msrb.mxu2 %v4456_v35  ;;  %v4256_v32 = vor.u32 %v5083_v25, %v4255_v37  ;;  %v5563_v35 = vpop.f32.mrf.mxu3  ;;  %v4239_v38 = vld [vmem:[#allocation8 + $0x48] sm:$0xf]  ;;  %v4489_v43 = vld [vmem:[#allocation8 + $0x250] sm:$0xf0]  ;;  %v4305_v25 = vld [vmem:[#allocation8 + $0xd8] sm:$0xf0] }
 0x12b   :  { %v1912_v22 = vmax.f32 %v1709_v26, 0.0  ;;  %v4664_v26 = vor.u32 %v5186_v42, %v4663_v20 }
 0x12c   :  { %2756 = vmatpush.bf16.msra.mxu0 %v4268_v51  ;;  %v4448_v51 = vor.u32 %v5131_v47, %v4447_v46  ;;  %v5111_v46 = vld [vmem:[#allocation8 + $0x154] sm:$0xf0] }
 0x12d   :  { %2770 = vmatpush.bf16.msra.mxu1 %v4396_v57  ;;  %v5557_v45 = vpack.c.bf16 %v1912_v22, %v1908_v33  ;;  %v4431_v57 = vld [vmem:[#allocation8 + $0x1c8] sm:$0xf]  ;;  %v4647_v33 = vld [vmem:[#allocation8 + $0x380] sm:$0xf]  ;;  %v5182_v22 = vld [vmem:[#allocation8 + $0x38c] sm:$0xf0] }
 0x12e   :  { %2781 = vmatpush.bf16.msra.mxu2 %v4572_v44  ;;  %v4432_v61 = vor.u32 %v5127_v54, %v4431_v57  ;;  %v4648_v40 = vor.u32 %v5182_v22, %v4647_v33  ;;  %v4367_v44 = vld [vmem:[#allocation8 + $0x148] sm:$0xf]  ;;  %v4473_v57 = vld [vmem:[#allocation8 + $0x230] sm:$0xf0]  ;;  %v1722_v59 = vpop.f32.mrf.mxu2 }
 0x12f   :  { %2719 = vmatmul.bf16.vlgmr.msrb.gmra.mxu1 %v5557_v45  ;;  %v4351_v54 = vld [vmem:[#allocation8 + $0x128] sm:$0xf] }
 0x130   :  { %2757 = vmatpush.bf16.msra.mxu0 %v4252_v3  ;;  %v5152_v3 = vld [vmem:[#allocation8 + $0x2a4] sm:$0xf] }
 0x131   :  { %2771 = vmatpush.bf16.msra.mxu1 %v4380_v8  ;;  %v4540_v7 = vor.u32 %v5152_v3, %v4537_v4  ;;  %v4288_v8 = vor.u32 %v5091_v63, %v4287_v58  ;;  %v353_v58 = vperm.slane %v5540_v30, 2  ;;  %v5071_v63 = vld [vmem:[#allocation8 + $0x14] sm:$0xf0]  ;;  %v4615_v3 = vld [vmem:[#allocation8 + $0x340] sm:$0xf] }
 0x132   :  { %2782 = vmatpush.bf16.msra.mxu2 %v4556_v55  ;;  %v5107_v55 = vld [vmem:[#allocation8 + $0x134] sm:$0xf0]  ;;  %v1736_v13 = vpop.f32.mrf.mxu3  ;;  %v4208_v16 = vor.u32 %v5071_v63, %v4207_v60  ;;  %v4665_v63 = vld [vmem:[#allocation8 + $0x3b0] sm:$0xf0] }
 0x133   :  { %v4352_v5 = vor.u32 %v5107_v55, %v4351_v54  ;;  %v5117_v54 = vld [vmem:[#allocation8 + $0x18c] sm:$0xf]  ;;  %v4401_v55 = vld [vmem:[#allocation8 + $0x198] sm:$0xf0] }
 0x134   :  { %2758 = vmatpush.bf16.msra.mxu0 %v4236_v15  ;;  %v4680_v15 = vor.u32 %v5190_v10, %v4679_v9  ;;  %v5103_v9 = vld [vmem:[#allocation8 + $0x114] sm:$0xf0]  ;;  %v5097_v10 = vld [vmem:[#allocation8 + $0xec] sm:$0xf] }
 0x135   :  { %2772 = vmatpush.bf16.msra.mxu1 %v4364_v23  ;;  %v4521_v23 = vld [vmem:[#allocation8 + $0x290] sm:$0xf0] }
 0x136   :  { %2783 = vmatpush.bf16.msra.mxu2 %v4540_v7  ;;  %v4524_v18 = vor.u32 %v5148_v62, %v4521_v23  ;;  %2740 = vmatpush.bf16.msrb.mxu3 %v4680_v15  ;;  %v5132_v7 = vld [vmem:[#allocation8 + $0x204] sm:$0xf]  ;;  %v4321_v62 = vld [vmem:[#allocation8 + $0xf8] sm:$0xf0]  ;;  %v1721_v23 = vadd.f32 %v5561_v2, %v353_v58  ;;  %v4583_v2 = vld [vmem:[#allocation8 + $0x300] sm:$0xf] }
 0x137   :  { %v4449_v15 = vld [vmem:[#allocation8 + $0x1f8] sm:$0xf0]  ;;  %v4324_v37 = vor.u32 %v5097_v10, %v4321_v62 }
 0x138   :  { %2759 = vmatpush.bf16.msra.mxu0 %v4220_v28  ;;  %v4383_v28 = vld [vmem:[#allocation8 + $0x168] sm:$0xf]  ;;  %v4452_v42 = vor.u32 %v5129_v14, %v4449_v15 }
 0x139   :  { %2773 = vmatpush.bf16.msra.mxu1 %v4348_v34  ;;  %v5140_v34 = vld [vmem:[#allocation8 + $0x244] sm:$0xf]  ;;  %v4384_v36 = vor.u32 %v5115_v29, %v4383_v28  ;;  %v1735_v28 = vadd.f32 %v5563_v35, %v1721_v23  ;;  %v1723_v29 = vadd.f32 %v1722_v59, %v353_v58  ;;  %v4417_v35 = vld [vmem:[#allocation8 + $0x1b8] sm:$0xf0]  ;;  %v5077_v23 = vld [vmem:[#allocation8 + $0x4c] sm:$0xf] }
 0x13a   :  { %2784 = vmatpush.bf16.msra.mxu2 %v4524_v18  ;;  %2741 = vmatpush.bf16.msrb.mxu3 %v4664_v26  ;;  %v4492_v47 = vor.u32 %v5140_v34, %v4489_v43  ;;  %v5170_v18 = vld [vmem:[#allocation8 + $0x32c] sm:$0xf0]  ;;  %v5192_v34 = vld [vmem:[#allocation8 + $0x3e4] sm:$0xf]  ;;  %v5121_v43 = vld [vmem:[#allocation8 + $0x1ac] sm:$0xf] }
 0x13b   :  { %v4600_v20 = vor.u32 %v5170_v18, %v4599_v17 }
 0x13c   :  { %2760 = vmatpush.bf16.msra.mxu0 %v4204_v48  ;;  %v4240_v48 = vor.u32 %v5079_v39, %v4239_v38  ;;  %v4436_v38 = vor.u32 %v5125_v41, %v4433_v27  ;;  %v5089_v39 = vld [vmem:[#allocation8 + $0xac] sm:$0xf] }
 0x13d   :  { %2774 = vmatpush.bf16.msra.mxu1 %v4332_v49  ;;  %v4223_v49 = vld [vmem:[#allocation8 + $0x28] sm:$0xf]  ;;  %v1762_v26 = vpop.f32.mrf.mxu1 }
 0x13e   :  { %2785 = vmatpush.bf16.msra.mxu2 %v4508_v31  ;;  %2742 = vmatpush.bf16.msrb.mxu3 %v4648_v40  ;;  %v1748_v4 = vpop.f32.mrf.mxu0  ;;  %v5166_v31 = vld [vmem:[#allocation8 + $0x30c] sm:$0xf0]  ;;  %v4289_v40 = vld [vmem:[#allocation8 + $0xb8] sm:$0xf0] }
 0x13f   :  { %2761 = vmatmul.bf16.vlgmr.msra.gmra.mxu0 %v5554_v21  ;;  %v4584_v22 = vor.u32 %v5166_v31, %v4583_v2 }
 0x140   :  { %2809 = vmatpush.bf16.msrb.mxu0 %v4320_v50  ;;  %2775 = vmatmul.bf16.vlgmr.msra.gmra.mxu1 %v5557_v45  ;;  %v4631_v50 = vld [vmem:[#allocation8 + $0x360] sm:$0xf] }
 0x141   :  { %2823 = vmatpush.bf16.msrb.mxu1 %v4448_v51  ;;  %v4368_v51 = vor.u32 %v5111_v46, %v4367_v44  ;;  %v4632_v0 = vor.u32 %v5178_v11, %v4631_v50  ;;  %v1749_v50 = vadd.f32 %v1748_v4, %v1735_v28  ;;  %v4257_v4 = vld [vmem:[#allocation8 + $0x78] sm:$0xf0]  ;;  %v5073_v28 = vld [vmem:[#allocation8 + $0x2c] sm:$0xf] }
 0x142   :  { %2786 = vmatpush.bf16.msra.mxu2 %v4492_v47  ;;  %v5188_v47 = vld [vmem:[#allocation8 + $0x3c4] sm:$0xf] }
 0x143   :  { %2743 = vmatpush.bf16.msrb.mxu3 %v4632_v0  ;;  %v4420_v0 = vor.u32 %v5121_v43, %v4417_v35  ;;  %v5069_v35 = vld [vmem:[#allocation8 + $0xc] sm:$0xf] }
 0x144   :  { %2810 = vmatpush.bf16.msrb.mxu0 %v4304_v56  ;;  %v4476_v56 = vor.u32 %v5136_v53, %v4473_v57  ;;  %v5085_v53 = vld [vmem:[#allocation8 + $0x8c] sm:$0xf]  ;;  %v4273_v57 = vld [vmem:[#allocation8 + $0x98] sm:$0xf0] }
 0x145   :  { %2824 = vmatpush.bf16.msrb.mxu1 %v4432_v61  ;;  %v4224_v61 = vor.u32 %v5075_v52, %v4223_v49  ;;  %v1737_v49 = vadd.f32 %v1736_v13, %v1723_v29  ;;  %v1790_v11 = vpop.f32.mrf.mxu3  ;;  %v1764_v59 = vpop.f32.mrf.mxu1  ;;  %v4276_v60 = vor.u32 %v5085_v53, %v4273_v57  ;;  %v4649_v13 = vld [vmem:[#allocation8 + $0x390] sm:$0xf0]  ;;  %v4225_v29 = vld [vmem:[#allocation8 + $0x38] sm:$0xf0] }
 0x146   :  { %2787 = vmatpush.bf16.msra.mxu2 %v4476_v56  ;;  %v1750_v46 = vpop.f32.mrf.mxu0  ;;  %v1763_v56 = vadd.f32 %v1762_v26, %v1749_v50  ;;  %v5101_v50 = vld [vmem:[#allocation8 + $0x10c] sm:$0xf] }
 0x147   :  { %v1751_v58 = vadd.f32 %v1750_v46, %v1737_v49 }
 0x148   :  { %2811 = vmatpush.bf16.msrb.mxu0 %v4288_v8  ;;  %v4457_v8 = vld [vmem:[#allocation8 + $0x210] sm:$0xf0] }
 0x149   :  { %2825 = vmatpush.bf16.msrb.mxu1 %v4416_v12  ;;  %v4616_v12 = vor.u32 %v5174_v6, %v4615_v3  ;;  %v4460_v30 = vor.u32 %v5132_v7, %v4457_v8  ;;  %v5081_v3 = vld [vmem:[#allocation8 + $0x6c] sm:$0xf]  ;;  %v1765_v62 = vadd.f32 %v1764_v59, %v1751_v58 }
 0x14a   :  { %v5113_v8 = vld [vmem:[#allocation8 + $0x16c] sm:$0xf] }
 0x14b   :  { %2744 = vmatpush.bf16.msrb.mxu3 %v4616_v12  ;;  %2788 = vmatpush.bf16.msra.mxu2 %v4460_v30  ;;  %v4260_v12 = vor.u32 %v5081_v3, %v4257_v4  ;;  %v5180_v30 = vld [vmem:[#allocation8 + $0x384] sm:$0xf]  ;;  %v4585_v3 = vld [vmem:[#allocation8 + $0x310] sm:$0xf0] }
 0x14c   :  { %2812 = vmatpush.bf16.msrb.mxu0 %v4272_v19  ;;  %v4336_v19 = vor.u32 %v5103_v9, %v4335_v1  ;;  %v4404_v1 = vor.u32 %v5117_v54, %v4401_v55  ;;  %v4385_v9 = vld [vmem:[#allocation8 + $0x178] sm:$0xf0]  ;;  %v4652_v17 = vor.u32 %v5180_v30, %v4649_v13  ;;  %v5168_v54 = vld [vmem:[#allocation8 + $0x324] sm:$0xf]  ;;  %v4601_v55 = vld [vmem:[#allocation8 + $0x330] sm:$0xf0] }
 0x14d   :  { %2826 = vmatpush.bf16.msrb.mxu1 %v4400_v24  ;;  %v5093_v24 = vld [vmem:[#allocation8 + $0xcc] sm:$0xf]  ;;  %v4388_v15 = vor.u32 %v5113_v8, %v4385_v9  ;;  %v1792_v18 = vpop.f32.mrf.mxu3  ;;  %v4604_v58 = vor.u32 %v5168_v54, %v4601_v55  ;;  %v4527_v9 = vld [vmem:[#allocation8 + $0x288] sm:$0xf]  ;;  %v5195_v55 = vld [vmem:[#allocation8 + $0x3f4] sm:$0xf0] }
 0x14e   :  { %v4308_v33 = vor.u32 %v5093_v24, %v4305_v25  ;;  %v5176_v24 = vld [vmem:[#allocation8 + $0x364] sm:$0xf]  ;;  %v4633_v25 = vld [vmem:[#allocation8 + $0x370] sm:$0xf0]  ;;  %v4511_v13 = vld [vmem:[#allocation8 + $0x268] sm:$0xf] }
 0x14f   :  { %2745 = vmatpush.bf16.msrb.mxu3 %v4600_v20  ;;  %v4636_v2 = vor.u32 %v5176_v24, %v4633_v25  ;;  %v4479_v25 = vld [vmem:[#allocation8 + $0x228] sm:$0xf] }
 0x150   :  { %2813 = vmatpush.bf16.msrb.mxu0 %v4256_v32  ;;  %v1776_v32 = vpop.f32.mrf.mxu2  ;;  %v4703_v54 = vld [vmem:[#allocation8 + $0x3e8] sm:$0xf] }
 0x151   :  { %2827 = vmatpush.bf16.msrb.mxu1 %v4384_v36  ;;  %v4697_v36 = vld [vmem:[#allocation8 + $0x3f0] sm:$0xf0]  ;;  %v1777_v10 = vadd.f32 %v1776_v32, %v1763_v56  ;;  %v5105_v32 = vld [vmem:[#allocation8 + $0x12c] sm:$0xf] }
 0x152   :  { %v4700_v44 = vor.u32 %v5192_v34, %v4697_v36  ;;  %v4575_v34 = vld [vmem:[#allocation8 + $0x2e8] sm:$0xf]  ;;  %v5163_v36 = vld [vmem:[#allocation8 + $0x2f4] sm:$0xf0] }
 0x153   :  { %2746 = vmatpush.bf16.msrb.mxu3 %v4584_v22  ;;  %v1791_v20 = vadd.f32 %v1790_v11, %v1777_v10  ;;  %v4576_v49 = vor.u32 %v5163_v36, %v4575_v34  ;;  %v4337_v11 = vld [vmem:[#allocation8 + $0x118] sm:$0xf0]  ;;  %v5151_v10 = vld [vmem:[#allocation8 + $0x294] sm:$0xf0] }
 0x154   :  { %2814 = vmatpush.bf16.msrb.mxu0 %v4240_v48  ;;  %v4681_v48 = vld [vmem:[#allocation8 + $0x3d0] sm:$0xf0]  ;;  %v4340_v56 = vor.u32 %v5101_v50, %v4337_v11  ;;  %v4577_v34 = vld [vmem:[#allocation8 + $0x2f8] sm:$0xf0] }
 0x155   :  { %2828 = vmatpush.bf16.msrb.mxu1 %v4368_v51  ;;  %v4292_v51 = vor.u32 %v5089_v39, %v4289_v40  ;;  %v4684_v52 = vor.u32 %v5188_v47, %v4681_v48  ;;  %v5172_v39 = vld [vmem:[#allocation8 + $0x344] sm:$0xf]  ;;  %v4617_v40 = vld [vmem:[#allocation8 + $0x350] sm:$0xf0]  ;;  %v4209_v47 = vld [vmem:[#allocation8 + $0x18] sm:$0xf0] }
 0x156   :  { %v4620_v48 = vor.u32 %v5172_v39, %v4617_v40  ;;  %v4212_v57 = vor.u32 %v5069_v35, %v4209_v47  ;;  %v4561_v35 = vld [vmem:[#allocation8 + $0x2d8] sm:$0xf0] }
 0x157   :  { %2795 = vmatpush.bf16.msra.mxu3 %v4700_v44 }
 0x158   :  { %2815 = vmatpush.bf16.msrb.mxu0 %v4224_v61  ;;  %v5184_v61 = vld [vmem:[#allocation8 + $0x3a4] sm:$0xf]  ;;  %v1778_v6 = vpop.f32.mrf.mxu2 }
 0x159   :  { %2829 = vmatpush.bf16.msrb.mxu1 %v4352_v5  ;;  %v4668_v5 = vor.u32 %v5184_v61, %v4665_v63  ;;  %v1779_v14 = vadd.f32 %v1778_v6, %v1765_v62  ;;  %v5155_v61 = vld [vmem:[#allocation8 + $0x2b4] sm:$0xf0] }
 0x15b   :  { %2796 = vmatpush.bf16.msra.mxu3 %v4684_v52  ;;  %v1793_v26 = vadd.f32 %v1792_v18, %v1779_v14  ;;  %v4559_v52 = vld [vmem:[#allocation8 + $0x2c8] sm:$0xf]  ;;  %v5147_v14 = vld [vmem:[#allocation8 + $0x274] sm:$0xf0] }
 0x15c   :  { %2816 = vmatpush.bf16.msrb.mxu0 %v4208_v16  ;;  %v4241_v16 = vld [vmem:[#allocation8 + $0x58] sm:$0xf0] }
 0x15d   :  { %2830 = vmatpush.bf16.msrb.mxu1 %v4336_v19  ;;  %v5109_v19 = vld [vmem:[#allocation8 + $0x14c] sm:$0xf]  ;;  %v1818_v53 = vpop.f32.mrf.mxu1 }
 0x15e   :  { %v1804_v7 = vpop.f32.mrf.mxu0 }
 0x15f   :  { %2817 = vmatmul.bf16.vlgmr.msrb.gmra.mxu0 %v5554_v21  ;;  %2797 = vmatpush.bf16.msra.mxu3 %v4668_v5  ;;  %v1805_v41 = vadd.f32 %v1804_v7, %v1791_v20  ;;  %v5244_v7 = vld [vmem:[#allocation7] sm:$0xf] }
 0x160   :  { %2865 = vmatpush.bf16.msra.mxu0 %v4324_v37  ;;  %2831 = vmatmul.bf16.vlgmr.msrb.gmra.mxu1 %v5557_v45  ;;  %v4369_v37 = vld [vmem:[#allocation8 + $0x158] sm:$0xf0]  ;;  %v354_v8 = vperm.slane %v5244_v7, 3  ;;  %v5145_v7 = vld [vmem:[#allocation8 + $0x26c] sm:$0xf] }
 0x161   :  { %2879 = vmatpush.bf16.msra.mxu1 %v4452_v42  ;;  %v4244_v42 = vor.u32 %v5077_v23, %v4241_v16  ;;  %v4372_v27 = vor.u32 %v5109_v19, %v4369_v37  ;;  %v1909_v43 = vmax.f32 %v1805_v41, 0.0  ;;  %v4512_v23 = vor.u32 %v5147_v14, %v4511_v13  ;;  %v4495_v37 = vld [vmem:[#allocation8 + $0x248] sm:$0xf]  ;;  %v4497_v13 = vld [vmem:[#allocation8 + $0x258] sm:$0xf0] }
 0x162   :  { %v1819_v30 = vadd.f32 %v1818_v53, %v354_v8  ;;  %v4545_v53 = vld [vmem:[#allocation8 + $0x2b8] sm:$0xf0]  ;;  %v4655_v14 = vld [vmem:[#allocation8 + $0x388] sm:$0xf] }
 0x163   :  { %2798 = vmatpush.bf16.msra.mxu3 %v4652_v17 }
 0x164   :  { %2866 = vmatpush.bf16.msra.mxu0 %v4308_v33  ;;  %v4353_v33 = vld [vmem:[#allocation8 + $0x138] sm:$0xf0] }
 0x165   :  { %2880 = vmatpush.bf16.msra.mxu1 %v4436_v38  ;;  %v4228_v38 = vor.u32 %v5073_v28, %v4225_v29  ;;  %v4356_v46 = vor.u32 %v5105_v32, %v4353_v33  ;;  %v1832_v63 = vpop.f32.mrf.mxu2  ;;  %v1846_v4 = vpop.f32.mrf.mxu3  ;;  %v4463_v32 = vld [vmem:[#allocation8 + $0x208] sm:$0xf]  ;;  %v5135_v33 = vld [vmem:[#allocation8 + $0x214] sm:$0xf0] }
 0x166   :  { %v1806_v31 = vpop.f32.mrf.mxu0  ;;  %v1820_v62 = vpop.f32.mrf.mxu1  ;;  %v1833_v16 = vadd.f32 %v1832_v63, %v1819_v30  ;;  %v4464_v39 = vor.u32 %v5135_v33, %v4463_v32  ;;  %v4529_v63 = vld [vmem:[#allocation8 + $0x298] sm:$0xf0]  ;;  %v5141_v30 = vld [vmem:[#allocation8 + $0x24c] sm:$0xf] }
 0x167   :  { %v1807_v22 = vadd.f32 %v1806_v31, %v1793_v26  ;;  %2799 = vmatpush.bf16.msra.mxu3 %v4636_v2  ;;  %v1821_v17 = vadd.f32 %v1820_v62, %v354_v8  ;;  %v5139_v26 = vld [vmem:[#allocation8 + $0x234] sm:$0xf0]  ;;  %v4513_v8 = vld [vmem:[#allocation8 + $0x278] sm:$0xf0]  ;;  %v5193_v32 = vld [vmem:[#allocation8 + $0x3ec] sm:$0xf] }
 0x168   :  { %2867 = vmatpush.bf16.msra.mxu0 %v4292_v51  ;;  %v4480_v28 = vor.u32 %v5139_v26, %v4479_v25  ;;  %v4516_v62 = vor.u32 %v5145_v7, %v4513_v8  ;;  %v5175_v25 = vld [vmem:[#allocation8 + $0x354] sm:$0xf0]  ;;  %v4705_v33 = vld [vmem:[#allocation8 + $0x3f8] sm:$0xf0]  ;;  %v5209_v7 = vld [vmem:[#allocation11 + $0x68] sm:$0xff] }
 0x169   :  { %2881 = vmatpush.bf16.msra.mxu1 %v4420_v0  ;;  %v1913_v44 = vmax.f32 %v1807_v22, 0.0  ;;  %v5159_v0 = vld [vmem:[#allocation8 + $0x2d4] sm:$0xf0]  ;;  %v5161_v22 = vld [vmem:[#allocation8 + $0x2ec] sm:$0xf]  ;;  %v5208_v8 = vld [vmem:[#allocation11 + $0x60] sm:$0xff] }
 0x16a   :  { %v4560_v59 = vor.u32 %v5159_v0, %v4559_v52  ;;  %v5153_v0 = vld [vmem:[#allocation8 + $0x2ac] sm:$0xf] }
 0x16b   :  { %v5571_v51 = vpack.c.bf16 %v1913_v44, %v1909_v43  ;;  %2800 = vmatpush.bf16.msra.mxu3 %v4620_v48  ;;  %v4580_v43 = vor.u32 %v5161_v22, %v4577_v34  ;;  %v4708_v34 = vor.u32 %v5193_v32, %v4705_v33 }
 0x16c   :  { %2868 = vmatpush.bf16.msra.mxu0 %v4276_v60  ;;  %v4543_v60 = vld [vmem:[#allocation8 + $0x2a8] sm:$0xf] }
 0x16d   :  { %2882 = vmatpush.bf16.msra.mxu1 %v4404_v1  ;;  %2733 = vmatmul.bf16.vlgmr.msrb.gmra.mxu2 %v5571_v51  ;;  %v5164_v1 = vld [vmem:[#allocation8 + $0x304] sm:$0xf]  ;;  %v4544_v6 = vor.u32 %v5155_v61, %v4543_v60  ;;  %v1848_v18 = vpop.f32.mrf.mxu3  ;;  %v4704_v60 = vor.u32 %v5195_v55, %v4703_v54  ;;  %v5149_v61 = vld [vmem:[#allocation8 + $0x28c] sm:$0xf]  ;;  %v4593_v55 = vld [vmem:[#allocation8 + $0x318] sm:$0xf0] }
 0x16e   :  { %2837 = vmatpush.bf16.msrb.mxu2 %v4576_v49  ;;  %v4588_v5 = vor.u32 %v5164_v1, %v4585_v3  ;;  %v4687_v3 = vld [vmem:[#allocation8 + $0x3c8] sm:$0xf]  ;;  %v5165_v54 = vld [vmem:[#allocation8 + $0x30c] sm:$0xf] }
 0x16f   :  { %2801 = vmatpush.bf16.msra.mxu3 %v4604_v58 }
 0x170   :  { %2869 = vmatpush.bf16.msra.mxu0 %v4260_v12  ;;  %v4528_v12 = vor.u32 %v5151_v10, %v4527_v9  ;;  %v4671_v9 = vld [vmem:[#allocation8 + $0x3a8] sm:$0xf]  ;;  %v5187_v10 = vld [vmem:[#allocation8 + $0x3b4] sm:$0xf0] }
 0x171   :  { %2883 = vmatpush.bf16.msra.mxu1 %v4388_v15  ;;  %v1834_v15 = vpop.f32.mrf.mxu2 }
 0x172   :  { %2838 = vmatpush.bf16.msrb.mxu2 %v4560_v59  ;;  %v1835_v24 = vadd.f32 %v1834_v15, %v1821_v17  ;;  %v4548_v59 = vor.u32 %v5153_v0, %v4545_v53  ;;  %v5183_v15 = vld [vmem:[#allocation8 + $0x394] sm:$0xf0]  ;;  %v5137_v17 = vld [vmem:[#allocation8 + $0x22c] sm:$0xf]  ;;  %v4609_v53 = vld [vmem:[#allocation8 + $0x338] sm:$0xf0] }
 0x173   :  { %2802 = vmatpush.bf16.msra.mxu3 %v4588_v5  ;;  %v4532_v5 = vor.u32 %v5149_v61, %v4529_v63  ;;  %v5169_v0 = vld [vmem:[#allocation8 + $0x32c] sm:$0xf]  ;;  %v5200_v61 = vld [vmem:[#allocation11 + $0x20] sm:$0xff]  ;;  %v5199_v63 = vld [vmem:[#allocation11 + $0x18] sm:$0xff] }
 0x174   :  { %2870 = vmatpush.bf16.msra.mxu0 %v4244_v42  ;;  %v1847_v42 = vadd.f32 %v1846_v4, %v1833_v16  ;;  %v1849_v29 = vadd.f32 %v1848_v18, %v1835_v24  ;;  %v5191_v4 = vld [vmem:[#allocation8 + $0x3d4] sm:$0xf0]  ;;  %v4656_v16 = vor.u32 %v5183_v15, %v4655_v14  ;;  %v4481_v18 = vld [vmem:[#allocation8 + $0x238] sm:$0xf0]  ;;  %v4623_v24 = vld [vmem:[#allocation8 + $0x348] sm:$0xf] }
 0x175   :  { %2884 = vmatpush.bf16.msra.mxu1 %v4372_v27  ;;  %v5218_v14 = vld [vmem:[#allocation11 + $0xb0] sm:$0xff]  ;;  %v5205_v15 = vld [vmem:[#allocation11 + $0x48] sm:$0xff] }
 0x176   :  { %2839 = vmatpush.bf16.msrb.mxu2 %v4544_v6  ;;  %v4688_v6 = vor.u32 %v5191_v4, %v4687_v3  ;;  %v5211_v3 = vld [vmem:[#allocation11 + $0x78] sm:$0xff]  ;;  %v5198_v4 = vld [vmem:[#allocation11 + $0x10] sm:$0xff] }
 0x178   :  { %2871 = vmatpush.bf16.msra.mxu0 %v4228_v38 }
 0x179   :  { %2885 = vmatpush.bf16.msra.mxu1 %v4356_v46  ;;  %v5157_v46 = vld [vmem:[#allocation8 + $0x2cc] sm:$0xf] }
 0x17a   :  { %2840 = vmatpush.bf16.msrb.mxu2 %v4528_v12  ;;  %v4564_v11 = vor.u32 %v5157_v46, %v4561_v35  ;;  %v4672_v12 = vor.u32 %v5187_v10, %v4671_v9  ;;  %v5181_v46 = vld [vmem:[#allocation8 + $0x38c] sm:$0xf]  ;;  %v4657_v35 = vld [vmem:[#allocation8 + $0x398] sm:$0xf0] }
 0x17b   :  { %v5207_v9 = vld [vmem:[#allocation11 + $0x58] sm:$0xff] }
 0x17c   :  { %2872 = vmatpush.bf16.msra.mxu0 %v4212_v57  ;;  %v5219_v10 = vld [vmem:[#allocation11 + $0xb8] sm:$0xff] }
 0x17d   :  { %2886 = vmatpush.bf16.msra.mxu1 %v4340_v56  ;;  %2789 = vmatmul.bf16.vlgmr.msra.gmra.mxu2 %v5571_v51  ;;  %v1874_v20 = vpop.f32.mrf.mxu1 }
 0x17e   :  { %v1860_v19 = vpop.f32.mrf.mxu0  ;;  %2841 = vmatpush.bf16.msrb.mxu2 %v4512_v23  ;;  %v4500_v23 = vor.u32 %v5141_v30, %v4497_v13  ;;  %v5206_v13 = vld [vmem:[#allocation11 + $0x50] sm:$0xff] }
 0x17f   :  { %2873 = vmatmul.bf16.vlgmr.msra.gmra.mxu0 %v5554_v21  ;;  %v5143_v21 = vld [vmem:[#allocation8 + $0x254] sm:$0xf0]  ;;  %v1861_v41 = vadd.f32 %v1860_v19, %v1847_v42  ;;  %v4639_v19 = vld [vmem:[#allocation8 + $0x368] sm:$0xf]  ;;  %v4465_v42 = vld [vmem:[#allocation8 + $0x218] sm:$0xf0] }
 0x180   :  { %2887 = vmatmul.bf16.vlgmr.msra.gmra.mxu1 %v5557_v45  ;;  %v4496_v45 = vor.u32 %v5143_v21, %v4495_v37  ;;  %v5179_v37 = vld [vmem:[#allocation8 + $0x374] sm:$0xf0]  ;;  %v4484_v21 = vor.u32 %v5137_v17, %v4481_v18 }
 0x181   :  { %v1875_v36 = vadd.f32 %v1874_v20, %v1861_v41  ;;  %v4640_v20 = vor.u32 %v5179_v37, %v4639_v19  ;;  %v4624_v41 = vor.u32 %v5175_v25, %v4623_v24  ;;  %3207 = vmatpush.bf16.msrb.mxu1 %v5211_v3  ;;  %v5204_v19 = vld [vmem:[#allocation11 + $0x40] sm:$0xff] }
 0x182   :  { %2842 = vmatpush.bf16.msrb.mxu2 %v4496_v45  ;;  %v5133_v45 = vld [vmem:[#allocation8 + $0x20c] sm:$0xf]  ;;  %v5216_v37 = vld [vmem:[#allocation11 + $0xa0] sm:$0xff] }
 0x183   :  { %v4468_v26 = vor.u32 %v5133_v45, %v4465_v42  ;;  %v5215_v45 = vld [vmem:[#allocation11 + $0x98] sm:$0xff] }
 0x185   :  { %v1888_v27 = vpop.f32.mrf.mxu2  ;;  %v1902_v2 = vpop.f32.mrf.mxu3 }
 0x186   :  { %v1862_v31 = vpop.f32.mrf.mxu0  ;;  %2843 = vmatpush.bf16.msrb.mxu2 %v4480_v28  ;;  %v1889_v40 = vadd.f32 %v1888_v27, %v1875_v36  ;;  %v1876_v44 = vpop.f32.mrf.mxu1  ;;  %v4607_v27 = vld [vmem:[#allocation8 + $0x328] sm:$0xf]  ;;  %v5171_v28 = vld [vmem:[#allocation8 + $0x334] sm:$0xf0]  ;;  %v5189_v36 = vld [vmem:[#allocation8 + $0x3cc] sm:$0xf] }
 0x187   :  { %v1863_v38 = vadd.f32 %v1862_v31, %v1849_v29  ;;  %v4608_v29 = vor.u32 %v5171_v28, %v4607_v27  ;;  %v5167_v31 = vld [vmem:[#allocation8 + $0x314] sm:$0xf0] }
 0x188   :  { %v1903_v49 = vadd.f32 %v1902_v2, %v1889_v40  ;;  %v4591_v2 = vld [vmem:[#allocation8 + $0x308] sm:$0xf]  ;;  %v5185_v40 = vld [vmem:[#allocation8 + $0x3ac] sm:$0xf]  ;;  %v5214_v27 = vld [vmem:[#allocation11 + $0x90] sm:$0xff] }
 0x189   :  { %v1877_v47 = vadd.f32 %v1876_v44, %v1863_v38  ;;  %v4592_v22 = vor.u32 %v5167_v31, %v4591_v2  ;;  %v4689_v38 = vld [vmem:[#allocation8 + $0x3d8] sm:$0xf0] }
 0x18a   :  { %2844 = vmatpush.bf16.msrb.mxu2 %v4464_v39  ;;  %v1910_v56 = vmax.f32 %v1903_v49, 0.0  ;;  %v4692_v39 = vor.u32 %v5189_v36, %v4689_v38 }
 0x18d   :  { %v1890_v48 = vpop.f32.mrf.mxu2  ;;  %v1904_v52 = vpop.f32.mrf.mxu3  ;;  %2845 = vmatmul.bf16.vlgmr.msrb.gmra.mxu2 %v5571_v51 }
 0x18e   :  { %v1891_v50 = vadd.f32 %v1890_v48, %v1877_v47  ;;  %2893 = vmatpush.bf16.msra.mxu2 %v4580_v43  ;;  %v4673_v43 = vld [vmem:[#allocation8 + $0x3b8] sm:$0xf0]  ;;  %v5177_v47 = vld [vmem:[#allocation8 + $0x36c] sm:$0xf] }
 0x18f   :  { %v4676_v44 = vor.u32 %v5185_v40, %v4673_v43  ;;  %v4641_v48 = vld [vmem:[#allocation8 + $0x378] sm:$0xf0]  ;;  %v5212_v40 = vld [vmem:[#allocation11 + $0x80] sm:$0xff] }
 0x190   :  { %v1905_v57 = vadd.f32 %v1904_v52, %v1891_v50  ;;  %v4644_v49 = vor.u32 %v5177_v47, %v4641_v48  ;;  %v5173_v50 = vld [vmem:[#allocation8 + $0x34c] sm:$0xf]  ;;  %v5227_v43 = vld [vmem:[#allocation11 + $0xf8] sm:$0xff]  ;;  %v5226_v47 = vld [vmem:[#allocation11 + $0xf0] sm:$0xff] }
 0x192   :  { %v1914_v58 = vmax.f32 %v1905_v57, 0.0  ;;  %2894 = vmatpush.bf16.msra.mxu2 %v4564_v11  ;;  %v4625_v11 = vld [vmem:[#allocation8 + $0x358] sm:$0xf0]  ;;  %v4612_v57 = vor.u32 %v5169_v0, %v4609_v53 }
 0x193   :  { %v4628_v52 = vor.u32 %v5173_v50, %v4625_v11  ;;  %v5225_v11 = vld [vmem:[#allocation11 + $0xe8] sm:$0xff] }
 0x194   :  { %v5578_v1 = vpack.c.bf16 %v1914_v58, %v1910_v56  ;;  %v4596_v56 = vor.u32 %v5165_v54, %v4593_v55  ;;  %v5203_v58 = vld [vmem:[#allocation11 + $0x38] sm:$0xff]  ;;  %v5224_v55 = vld [vmem:[#allocation11 + $0xe0] sm:$0xff] }
 0x195   :  { %3193 = vmatpush.bf16.msrb.mxu0 %v5203_v58 }
 0x196   :  { %2747 = vmatmul.bf16.vlgmr.msrb.gmra.mxu3 %v5578_v1  ;;  %2895 = vmatpush.bf16.msra.mxu2 %v4548_v59  ;;  %v5202_v59 = vld [vmem:[#allocation11 + $0x30] sm:$0xff] }
 0x197   :  { %2851 = vmatpush.bf16.msrb.mxu3 %v4704_v60  ;;  %v5201_v60 = vld [vmem:[#allocation11 + $0x28] sm:$0xff] }
 0x199   :  { %3194 = vmatpush.bf16.msrb.mxu0 %v5202_v59 }
 0x19a   :  { %2896 = vmatpush.bf16.msra.mxu2 %v4532_v5  ;;  %v5210_v5 = vld [vmem:[#allocation11 + $0x70] sm:$0xff] }
 0x19b   :  { %2852 = vmatpush.bf16.msrb.mxu3 %v4688_v6  ;;  %3208 = vmatpush.bf16.msrb.mxu1 %v5210_v5  ;;  %v5197_v6 = vld [vmem:[#allocation11 + $0x8] sm:$0xff] }
 0x19d   :  { %3195 = vmatpush.bf16.msrb.mxu0 %v5201_v60 }
 0x19e   :  { %2897 = vmatpush.bf16.msra.mxu2 %v4516_v62  ;;  %v2706_v62 = vpop.f32.mrf.mxu0 }
 0x19f   :  { %2853 = vmatpush.bf16.msrb.mxu3 %v4672_v12  ;;  %3209 = vmatpush.bf16.msrb.mxu1 %v5209_v7 }
 0x1a1   :  { %3196 = vmatpush.bf16.msrb.mxu0 %v5200_v61 }
 0x1a2   :  { %2898 = vmatpush.bf16.msra.mxu2 %v4500_v23  ;;  %v5217_v23 = vld [vmem:[#allocation11 + $0xa8] sm:$0xff] }
 0x1a3   :  { %2854 = vmatpush.bf16.msrb.mxu3 %v4656_v16  ;;  %3210 = vmatpush.bf16.msrb.mxu1 %v5208_v8  ;;  %v5585_v16 = vld [vmem:[#allocation10] sm:$0xf] }
 0x1a4   :  { %v2051_v3 = vperm.slane %v5585_v16, 2 }
 0x1a5   :  { %3197 = vmatpush.bf16.msrb.mxu0 %v5199_v63 }
 0x1a6   :  { %2803 = vmatmul.bf16.vlgmr.msra.gmra.mxu3 %v5578_v1  ;;  %2899 = vmatpush.bf16.msra.mxu2 %v4484_v21  ;;  %v2708_v17 = vpop.f32.mrf.mxu0 }
 0x1a7   :  { %2855 = vmatpush.bf16.msrb.mxu3 %v4640_v20  ;;  %3211 = vmatpush.bf16.msrb.mxu1 %v5207_v9  ;;  %v2049_v20 = vperm.slane %v5585_v16, 0  ;;  %v5222_v9 = vld [vmem:[#allocation11 + $0xd0] sm:$0xff] }
 0x1a9   :  { %3198 = vmatpush.bf16.msrb.mxu0 %v5198_v4  ;;  %v2707_v24 = vadd.f32 %v2706_v62, %v2049_v20 }
 0x1aa   :  { %2900 = vmatpush.bf16.msra.mxu2 %v4468_v26  ;;  %v2709_v26 = vadd.f32 %v2708_v17, %v2049_v20 }
 0x1ab   :  { %2856 = vmatpush.bf16.msrb.mxu3 %v4624_v41  ;;  %3212 = vmatpush.bf16.msrb.mxu1 %v5206_v13 }
 0x1ac   :  { %v2720_v12 = vpop.f32.mrf.mxu1 }
 0x1ad   :  { %2901 = vmatmul.bf16.vlgmr.msra.gmra.mxu2 %v5571_v51  ;;  %v4660_v51 = vor.u32 %v5181_v46, %v4657_v35  ;;  %3199 = vmatpush.bf16.msrb.mxu0 %v5197_v6  ;;  %v2721_v41 = vadd.f32 %v2720_v12, %v2707_v24  ;;  %v2050_v46 = vperm.slane %v5585_v16, 1  ;;  %v5223_v6 = vld [vmem:[#allocation11 + $0xd8] sm:$0xff] }
 0x1ae   :  { %3221 = vmatpush.bf16.msrb.mxu2 %v5219_v10 }
 0x1af   :  { %2857 = vmatpush.bf16.msrb.mxu3 %v4608_v29  ;;  %3213 = vmatpush.bf16.msrb.mxu1 %v5205_v15 }
 0x1b2   :  { %3222 = vmatpush.bf16.msrb.mxu2 %v5218_v14 }
 0x1b3   :  { %2858 = vmatpush.bf16.msrb.mxu3 %v4592_v22  ;;  %3214 = vmatpush.bf16.msrb.mxu1 %v5204_v19  ;;  %v5213_v22 = vld [vmem:[#allocation11 + $0x88] sm:$0xff]  ;;  %v5220_v19 = vld [vmem:[#allocation11 + $0xc0] sm:$0xff] }
 0x1b4   :  { %v2722_v18 = vpop.f32.mrf.mxu1 }
 0x1b5   :  { %v2723_v28 = vadd.f32 %v2722_v18, %v2709_v26 }
 0x1b6   :  { %2859 = vmatmul.bf16.vlgmr.msrb.gmra.mxu3 %v5578_v1  ;;  %3223 = vmatpush.bf16.msrb.mxu2 %v5217_v23 }
 0x1b7   :  { %2907 = vmatpush.bf16.msra.mxu3 %v4708_v34 }
 0x1ba   :  { %3224 = vmatpush.bf16.msrb.mxu2 %v5216_v37 }
 0x1bb   :  { %2908 = vmatpush.bf16.msra.mxu3 %v4692_v39 }
 0x1bc   :  { %v2762_v25 = vpop.f32.mrf.mxu0 }
 0x1bd   :  { %v2776_v29 = vpop.f32.mrf.mxu1  ;;  %v2763_v50 = vadd.f32 %v2762_v25, %v2050_v46 }
 0x1be   :  { %3225 = vmatpush.bf16.msrb.mxu2 %v5215_v45 }
 0x1bf   :  { %2909 = vmatpush.bf16.msra.mxu3 %v4676_v44  ;;  %v2777_v0 = vadd.f32 %v2776_v29, %v2763_v50 }
 0x1c2   :  { %3226 = vmatpush.bf16.msrb.mxu2 %v5214_v27 }
 0x1c3   :  { %2910 = vmatpush.bf16.msra.mxu3 %v4660_v51 }
 0x1c4   :  { %v2764_v44 = vpop.f32.mrf.mxu0 }
 0x1c5   :  { %v2778_v51 = vpop.f32.mrf.mxu1 }
 0x1c6   :  { %3227 = vmatpush.bf16.msrb.mxu2 %v5213_v22 }
 0x1c7   :  { %2911 = vmatpush.bf16.msra.mxu3 %v4644_v49 }
 0x1ca   :  { %3228 = vmatpush.bf16.msrb.mxu2 %v5212_v40 }
 0x1cb   :  { %2912 = vmatpush.bf16.msra.mxu3 %v4628_v52  ;;  %v2765_v52 = vadd.f32 %v2764_v44, %v2050_v46 }
 0x1cf   :  { %2913 = vmatpush.bf16.msra.mxu3 %v4612_v57  ;;  %v2779_v57 = vadd.f32 %v2778_v51, %v2765_v52 }
 0x1d3   :  { %2914 = vmatpush.bf16.msra.mxu3 %v4596_v56 }
 0x1d6   :  { %2915 = vmatmul.bf16.vlgmr.msra.gmra.mxu3 %v5578_v1  ;;  %v5196_v1 = vld [vmem:[#allocation11] sm:$0xff] }
 0x1d7   :  { %3200 = vmatpush.bf16.msrb.mxu0 %v5196_v1  ;;  %3235 = vmatpush.bf16.msrb.mxu3 %v5227_v43 }
 0x1db   :  { %3236 = vmatpush.bf16.msrb.mxu3 %v5226_v47 }
 0x1dc   :  { %v2818_v53 = vpop.f32.mrf.mxu0 }
 0x1dd   :  { %v2832_v61 = vpop.f32.mrf.mxu1  ;;  %v2819_v8 = vadd.f32 %v2818_v53, %v2051_v3 }
 0x1df   :  { %3237 = vmatpush.bf16.msrb.mxu3 %v5225_v11  ;;  %v2833_v12 = vadd.f32 %v2832_v61, %v2819_v8 }
 0x1e3   :  { %3238 = vmatpush.bf16.msrb.mxu3 %v5224_v55 }
 0x1e4   :  { %v2820_v1 = vpop.f32.mrf.mxu0 }
 0x1e5   :  { %v2821_v62 = vadd.f32 %v2820_v1, %v2051_v3  ;;  %v2834_v13 = vpop.f32.mrf.mxu1 }
 0x1e7   :  { %3239 = vmatpush.bf16.msrb.mxu3 %v5223_v6  ;;  %v2835_v15 = vadd.f32 %v2834_v13, %v2821_v62 }
 0x1eb   :  { %3240 = vmatpush.bf16.msrb.mxu3 %v5222_v9 }
 0x1f0   :  { %v2734_v30 = vpop.f32.mrf.mxu2 }
 0x1f1   :  { %v2735_v2 = vadd.f32 %v2734_v30, %v2721_v41  ;;  %v5221_v30 = vld [vmem:[#allocation11 + $0xc8] sm:$0xff]  ;;  %v2052_v41 = vperm.slane %v5585_v16, 3  ;;  %v5243_v16 = vld [vmem:[%s5603_s6] ss:$0 sm:$0xff]  ;;  %s5436_s6 = smov 128  }
 0x1f2   :  { %3241 = vmatpush.bf16.msrb.mxu3 %v5221_v30 }
 0x1f6   :  { %3242 = vmatpush.bf16.msrb.mxu3 %v5220_v19 }
 0x1f8   :  { %v2736_v21 = vpop.f32.mrf.mxu2 }
 0x1f9   :  { %v2737_v32 = vadd.f32 %v2736_v21, %v2723_v28 }
 0x1fc   :  { %v2874_v24 = vpop.f32.mrf.mxu0 }
 0x1fd   :  { %v2888_v25 = vpop.f32.mrf.mxu1  ;;  %v2875_v28 = vadd.f32 %v2874_v24, %v2052_v41 }
 0x200   :  { %v2790_v31 = vpop.f32.mrf.mxu2 }
 0x201   :  { %v2791_v54 = vadd.f32 %v2790_v31, %v2777_v0  ;;  %v2889_v31 = vadd.f32 %v2888_v25, %v2875_v28 }
 0x204   :  { %v2876_v27 = vpop.f32.mrf.mxu0 }
 0x208   :  { %v2792_v48 = vpop.f32.mrf.mxu2 }
 0x209   :  { %v2793_v56 = vadd.f32 %v2792_v48, %v2779_v57 }
 0x210   :  { %v2846_v63 = vpop.f32.mrf.mxu2 }
 0x211   :  { %v2847_v23 = vadd.f32 %v2846_v63, %v2833_v12 }
 0x218   :  { %v2848_v14 = vpop.f32.mrf.mxu2 }
 0x219   :  { %v2748_v42 = vpop.f32.mrf.mxu3  ;;  %v2849_v17 = vadd.f32 %v2848_v14, %v2835_v15 }
 0x21a   :  { %v2749_v33 = vadd.f32 %v2748_v42, %v2735_v2  ;;  %v2877_v2 = vadd.f32 %v2876_v27, %v2052_v41 }
 0x21c   :  { %v2921_v38 = vmax.f32 %v2749_v33, 0.0 }
 0x221   :  { %v2750_v34 = vpop.f32.mrf.mxu3 }
 0x222   :  { %v2751_v36 = vadd.f32 %v2750_v34, %v2737_v32  ;;  %v2890_v32 = vpop.f32.mrf.mxu1 }
 0x223   :  { %v2891_v22 = vadd.f32 %v2890_v32, %v2877_v2 }
 0x224   :  { %v2925_v39 = vmax.f32 %v2751_v36, 0.0 }
 0x226   :  { %v2929_v35 = vpack.c.bf16 %v2925_v39, %v2921_v38 }
 0x228   :  { %3201 = vmatmul.bf16.vlgmr.msrb.gmra.mxu0 %v2929_v35 }
 0x229   :  { %v2804_v49 = vpop.f32.mrf.mxu3 }
 0x22a   :  { %v2805_v58 = vadd.f32 %v2804_v49, %v2791_v54 }
 0x22c   :  { %v2922_v4 = vmax.f32 %v2805_v58, 0.0 }
 0x230   :  { %v2902_v26 = vpop.f32.mrf.mxu2 }
 0x231   :  { %v2806_v59 = vpop.f32.mrf.mxu3  ;;  %v2903_v34 = vadd.f32 %v2902_v26, %v2889_v31 }
 0x232   :  { %v2807_v60 = vadd.f32 %v2806_v59, %v2793_v56 }
 0x234   :  { %v2926_v5 = vmax.f32 %v2807_v60, 0.0 }
 0x236   :  { %v2930_v7 = vpack.c.bf16 %v2926_v5, %v2922_v4 }
 0x238   :  { %3215 = vmatmul.bf16.vlgmr.msrb.gmra.mxu1 %v2930_v7  ;;  %v2904_v33 = vpop.f32.mrf.mxu2 }
 0x239   :  { %v2860_v10 = vpop.f32.mrf.mxu3  ;;  %v2905_v36 = vadd.f32 %v2904_v33, %v2891_v22 }
 0x23a   :  { %v2861_v18 = vadd.f32 %v2860_v10, %v2847_v23 }
 0x23c   :  { %v2923_v20 = vmax.f32 %v2861_v18, 0.0 }
 0x241   :  { %v2862_v37 = vpop.f32.mrf.mxu3 }
 0x242   :  { %v2863_v21 = vadd.f32 %v2862_v37, %v2849_v17 }
 0x244   :  { %v2927_v45 = vmax.f32 %v2863_v21, 0.0 }
 0x246   :  { %v2931_v42 = vpack.c.bf16 %v2927_v45, %v2923_v20 }
 0x248   :  { %3229 = vmatmul.bf16.vlgmr.msrb.gmra.mxu2 %v2931_v42 }
 0x259   :  { %v2916_v29 = vpop.f32.mrf.mxu3 }
 0x25a   :  { %v2917_v38 = vadd.f32 %v2916_v29, %v2903_v34 }
 0x25c   :  { %v2924_v43 = vmax.f32 %v2917_v38, 0.0 }
 0x261   :  { %v2918_v39 = vpop.f32.mrf.mxu3 }
 0x262   :  { %v2919_v40 = vadd.f32 %v2918_v39, %v2905_v36 }
 0x264   :  { %v2928_v44 = vmax.f32 %v2919_v40, 0.0 }
 0x266   :  { %v2932_v46 = vpack.c.bf16 %v2928_v44, %v2924_v43 }
 0x268   :  { %3243 = vmatmul.bf16.vlgmr.msrb.gmra.mxu3 %v2932_v46 }
 0x2a5   :  { %v3202_v35 = vpop.f32.mrf.mxu0 }
 0x2a6   :  { %v3203_v48 = vadd.f32 %v5243_v16, %v3202_v35 }
 0x2ad   :  { %v3204_v11 = vpop.f32.mrf.mxu0 }
 0x2ae   :  { %v3205_v57 = vadd.f32 %v5243_v16, %v3204_v11 }
 0x2b5   :  { %v3216_v51 = vpop.f32.mrf.mxu1 }
 0x2b6   :  { %v3217_v49 = vadd.f32 %v3216_v51, %v3203_v48 }
 0x2bd   :  { %v3218_v53 = vpop.f32.mrf.mxu1 }
 0x2be   :  { %v3219_v55 = vadd.f32 %v3218_v53, %v3205_v57 }
 0x2cb   :  { %v3230_v47 = vpop.f32.mrf.mxu2 }
 0x2cc   :  { %v3231_v50 = vadd.f32 %v3230_v47, %v3217_v49 }
 0x2d3   :  { %v3232_v54 = vpop.f32.mrf.mxu2 }
 0x2d4   :  { %v3233_v56 = vadd.f32 %v3232_v54, %v3219_v55 }
 0x2eb   :  { %v3244_v52 = vpop.f32.mrf.mxu3 }
 0x2ec   :  { %v3245_v0 = vadd.f32 %v3244_v52, %v3231_v50 }
 0x2ee   :  { %3249 = vst [vmem:[#allocation13] sm:$0xff] %v3245_v0 }
 0x2f3   :  { %v3246_v58 = vpop.f32.mrf.mxu3 }
 0x2f4   :  { %v3247_v59 = vadd.f32 %v3246_v58, %v3233_v56 }
 0x2f6   :  { %3250 = vst [vmem:[#allocation13 + $0x8] sm:$0xff] %v3247_v59 }
 0x2f7   :  { %3263 = dma.vmem_to_hbm [thread:$0]  %s3256_s11, 256, %s3258_s14, [#allocation4], %s5436_s6, %s5436_s6, %s5437_s15  }
 0x2f8   :  { %5421 = dma.done.wait [#allocation4], 256  }
 0x2f9   :  { %5422 = vsyncadd [#allocation4], 4294967040 }
 0x2fa   :  { %3268 = vsyncpa [#allocation3], 1 }
 0x2fb   :  { %3269 = vsyncpa [#allocation6], 1 }
 0x2fc   :  { %3270 = vsyncpa [#allocation9], 1 }
 0x2fd   :  { %3271 = vsyncpa [#allocation12], 1 }
 0x2fe   :  { %3272 = vsyncpa [#allocation4], 1 }

</bundles_post_ra>
